<compile_context>
chip_gen: v7x
topology: tpu7x:2x2x1
jax: 0.10.0
libtpu: 0.0.40
codegen_flags: <defaults>
</compile_context>

<pallas_src>
import functools
import math

import jax
import jax.numpy as jnp
from jax import lax
from jax.experimental import pallas as pl
from jax.experimental.pallas import tpu as pltpu


# ----------------------------------------------------------------------------
# Fused whole-model kernel (one grid step processes batch_per_step elements)
# ----------------------------------------------------------------------------
def _layernorm(x, g, b):
    mu = jnp.mean(x, axis=-1, keepdims=True)
    var = jnp.mean((x - mu) * (x - mu), axis=-1, keepdims=True)
    return (x - mu) * lax.rsqrt(var + 1e-12) * g + b          # BERT eps


def _gelu(x):
    # BERT tanh-approx GELU. TODO(synk): HF default is exact erf GELU.
    c = 0.7978845608028654
    return 0.5 * x * (1.0 + jnp.tanh(c * (x + 0.044715 * x * x * x)))


def _finbert_kernel(emb_ref, bias_ref, wqkv_ref, wo_ref, wi_ref, wo2_ref,
                    lvec_ref, gvec_ref, pw_ref, cw_ref, out_ref, *,
                    num_layers, num_heads, head_dim, seq_len, batch_per_step):
    H = num_heads * head_dim
    S = seq_len
    bpg = batch_per_step
    I = wi_ref.shape[-1]
    C = out_ref.shape[-1]
    scale = 1.0 / math.sqrt(head_dim)
    bf16 = jnp.bfloat16

    # ---- consolidated global vectors: emb LN gamma/beta, pooler/cls bias ----
    emb_g = gvec_ref[0:1, :]
    emb_b = gvec_ref[1:2, :]
    pooler_b = gvec_ref[2:3, :]
    cls_b = gvec_ref[3:4, 0:C]

    # ---- embeddings layernorm over flattened (bpg*S, H) rows ----
    x = _layernorm(emb_ref[...].astype(jnp.float32), emb_g, emb_b)

    # ---- encoder layers (L=2 -> static unroll; use fori_loop for large L) ----
    for l in range(num_layers):
        bqkv = lvec_ref[l, 0:1, 0:3 * H]
        bo = lvec_ref[l, 1:2, 0:H]
        ln1g = lvec_ref[l, 2:3, 0:H]
        ln1b = lvec_ref[l, 3:4, 0:H]
        bi = lvec_ref[l, 4:5, 0:I]
        bo2 = lvec_ref[l, 5:6, 0:H]
        ln2g = lvec_ref[l, 6:7, 0:H]
        ln2b = lvec_ref[l, 7:8, 0:H]

        # fused QKV: one (R,H)@(H,3H) bf16 matmul, f32 accumulate
        qkv = jnp.dot(x.astype(bf16), wqkv_ref[l],
                      preferred_element_type=jnp.float32) + bqkv
        qkv = qkv.astype(bf16)                         # MXU operands below

        ctx_rows = []
        for j in range(bpg):                            # per batch element
            r0 = j * S
            mb = bias_ref[j]                            # (1, S) additive mask
            head_ctx = []
            for h in range(num_heads):
                lo = h * head_dim
                # Intra-vreg lane slices (Dh=16) — kept on purpose, see header.
                q_h = qkv[r0:r0 + S, lo:lo + head_dim]
                k_h = qkv[r0:r0 + S, H + lo:H + lo + head_dim]
                v_h = qkv[r0:r0 + S, 2 * H + lo:2 * H + lo + head_dim]
                s = lax.dot_general(q_h, k_h, (((1,), (1,)), ((), ())),
                                    preferred_element_type=jnp.float32) * scale
                s = s + mb
                m = jnp.max(s, axis=-1, keepdims=True)
                p = jnp.exp(s - m)
                p = p * pl.reciprocal(jnp.sum(p, axis=-1, keepdims=True),
                                      approx=True)
                head_ctx.append(jnp.dot(p.astype(bf16), v_h,
                                        preferred_element_type=jnp.float32))
            # head concat: lane-select inside one vreg at H=32 (cheap)
            ctx_rows.append(head_ctx[0] if num_heads == 1
                            else jnp.concatenate(head_ctx, axis=-1))
        ctx = ctx_rows[0] if bpg == 1 else jnp.concatenate(ctx_rows, axis=0)

        # ONE output projection for all heads and all rows of this step
        attn = jnp.dot(ctx.astype(bf16), wo_ref[l],
                       preferred_element_type=jnp.float32) + bo

        # residual + LN fused
        x = _layernorm(x + attn, ln1g, ln1b)

        # FFN: up-proj + GELU, down-proj, residual + LN fused
        inter = jnp.dot(x.astype(bf16), wi_ref[l],
                        preferred_element_type=jnp.float32) + bi
        inter = _gelu(inter)
        ffn = jnp.dot(inter.astype(bf16), wo2_ref[l],
                      preferred_element_type=jnp.float32) + bo2
        x = _layernorm(x + ffn, ln2g, ln2b)

    # ---- pooler (dense + tanh on each [CLS] row) + classifier, batched ----
    if bpg == 1:
        cls = x[0:1, :]
    else:
        cls = jnp.concatenate([x[j * S:j * S + 1, :] for j in range(bpg)],
                              axis=0)                      # (bpg, H)
    pooled = jnp.tanh(jnp.dot(cls.astype(bf16), pw_ref[...],
                              preferred_element_type=jnp.float32) + pooler_b)
    # dropout(p=0.1) is identity at inference time.
    # TODO(synk): training-mode dropout (pltpu PRNG mask) not implemented.
    logits = jnp.dot(pooled.astype(bf16), cw_ref[...],
                     preferred_element_type=jnp.float32) + cls_b
    out_ref[0] = logits.astype(out_ref.dtype)              # (bpg, C)


# ----------------------------------------------------------------------------
# Synthetic FinBERT (tiny config), deterministic init, consolidated weights
# ----------------------------------------------------------------------------
class Config:
    vocab_size = 100
    hidden = 32
    num_heads = 2
    head_dim = 16
    intermediate = 64
    num_layers = 2
    max_pos = 16
    type_vocab = 2
    num_classes = 2


def init_params(cfg, key):
    def nrm(k, shape, scale=0.02, dtype=jnp.float32):
        return (scale * jax.random.normal(k, shape, dtype=jnp.float32)
                ).astype(dtype)

    ks = iter(jax.random.split(key, 24))
    L, H, I, C = cfg.num_layers, cfg.hidden, cfg.intermediate, cfg.num_classes
    Vw = max(3 * H, I)
    bf16 = jnp.bfloat16

    # Consolidated per-layer vectors (L, 8, Vw); rows:
    #   0 bqkv(3H) 1 bo(H) 2 ln1_g(H) 3 ln1_b(H) 4 bi(I) 5 bo2(H)
    #   6 ln2_g(H) 7 ln2_b(H)
    lvec = jnp.zeros((L, 8, Vw), jnp.float32)
    lvec = lvec.at[:, 0, :3 * H].set(nrm(next(ks), (L, 3 * H)))
    lvec = lvec.at[:, 1, :H].set(nrm(next(ks), (L, H)))
    lvec = lvec.at[:, 2, :H].set(1.0)
    lvec = lvec.at[:, 3, :H].set(nrm(next(ks), (L, H)))
    lvec = lvec.at[:, 4, :I].set(nrm(next(ks), (L, I)))
    lvec = lvec.at[:, 5, :H].set(nrm(next(ks), (L, H)))
    lvec = lvec.at[:, 6, :H].set(1.0)
    lvec = lvec.at[:, 7, :H].set(nrm(next(ks), (L, H)))

    # Consolidated global vectors (4, H): emb_ln_g, emb_ln_b, pooler_b, cls_b
    gvec = jnp.zeros((4, H), jnp.float32)
    gvec = gvec.at[0, :].set(1.0)
    gvec = gvec.at[1, :].set(nrm(next(ks), (H,)))
    gvec = gvec.at[2, :].set(nrm(next(ks), (H,)))
    gvec = gvec.at[3, :C].set(nrm(next(ks), (C,)))

    return {
        "word_emb": nrm(next(ks), (cfg.vocab_size, H)),
        "pos_emb": nrm(next(ks), (cfg.max_pos, H)),
        "type_emb": nrm(next(ks), (cfg.type_vocab, H)),
        # stacked bf16 matmul weights (QKV fused along columns)
        "wqkv": nrm(next(ks), (L, H, 3 * H), dtype=bf16),
        "wo": nrm(next(ks), (L, H, H), dtype=bf16),
        "wi": nrm(next(ks), (L, H, I), dtype=bf16),
        "wo2": nrm(next(ks), (L, I, H), dtype=bf16),
        "layer_vecs": lvec,
        "global_vecs": gvec,
        "pooler_w": nrm(next(ks), (H, H), dtype=bf16),
        "cls_w": nrm(next(ks), (H, C), dtype=bf16),
    }


def _grid_steps(batch):
    """1 grid step on single-TensorCore parts (v5e/v6e), >=2 where 2 TCs exist."""
    try:
        kind = jax.devices()[0].device_kind.lower()
    except Exception:
        kind = ""
    single_core = any(t in kind for t in ("lite", "v5e", "v6e"))
    steps = 1 if single_core else 2
    steps = max(1, min(batch, steps))
    while batch % steps:
        steps -= 1
    return max(steps, 1)


def finbert_forward(params, input_ids, attention_mask, cfg):
    B, S = input_ids.shape
    H, L, I, C = cfg.hidden, cfg.num_layers, cfg.intermediate, cfg.num_classes

    # ---- glue in XLA: embedding gather + additive mask bias (computed once) ----
    emb = (jnp.take(params["word_emb"], input_ids, axis=0)
           + params["pos_emb"][:S][None, :, :]
           + params["type_emb"][0][None, None, :])                    # (B,S,H)
    # TODO(synk): token_type_ids fixed to segment 0 (no segment-id input).
    emb = emb.reshape(B * S, H)                                        # row-flat
    mask_bias = ((1.0 - attention_mask.astype(jnp.float32)) * (-1e9)
                 ).reshape(B, 1, S)

    G = _grid_steps(B)
    bpg = B // G
    R = bpg * S
    Vw = params["layer_vecs"].shape[-1]

    kernel = functools.partial(
        _finbert_kernel, num_layers=L, num_heads=cfg.num_heads,
        head_dim=cfg.head_dim, seq_len=S, batch_per_step=bpg)

    def full(shape):  # whole-array block, constant block index (no re-DMA)
        n = len(shape)
        return pl.BlockSpec(shape, lambda g, _n=n: (0,) * _n)

    in_specs = [
        pl.BlockSpec((R, H), lambda g: (g, 0)),          # flattened embeddings
        pl.BlockSpec((bpg, 1, S), lambda g: (g, 0, 0)),  # additive mask bias
        full((L, H, 3 * H)),                             # wqkv  (bf16)
        full((L, H, H)),                                 # wo    (bf16)
        full((L, H, I)),                                 # wi    (bf16)
        full((L, I, H)),                                 # wo2   (bf16)
        full((L, 8, Vw)),                                # consolidated layer vecs
        full((4, H)),                                    # consolidated global vecs
        full((H, H)),                                    # pooler w (bf16)
        full((H, C)),                                    # classifier w (bf16)
    ]

    out = pl.pallas_call(
        kernel,
        grid=(G,),
        in_specs=in_specs,
        out_specs=pl.BlockSpec((1, bpg, C), lambda g: (g, 0, 0)),
        out_shape=jax.ShapeDtypeStruct((G, bpg, C), jnp.float32),
        compiler_params=pltpu.CompilerParams(
            dimension_semantics=("parallel",)),
    )(emb, mask_bias,
      params["wqkv"], params["wo"], params["wi"], params["wo2"],
      params["layer_vecs"], params["global_vecs"],
      params["pooler_w"], params["cls_w"])

    return out.reshape(B, C)


if __name__ == "__main__":
    cfg = Config()
    key = jax.random.PRNGKey(0)
    k_param, k_ids = jax.random.split(key)

    params = init_params(cfg, k_param)

    B, S = 2, 8
    input_ids = jax.random.randint(k_ids, (B, S), 0, cfg.vocab_size,
                                   dtype=jnp.int32)
    attention_mask = jnp.array([[1] * S, [1] * (S - 2) + [0, 0]],
                               dtype=jnp.int32)

    logits = finbert_forward(params, input_ids, attention_mask, cfg)
    logits = jax.block_until_ready(logits)
    assert logits.shape == (B, cfg.num_classes)
    assert bool(jnp.all(jnp.isfinite(logits)))
    print("KERNEL_OK")
</pallas_src>

<mosaic_0001>
module attributes {stable_mosaic.version = 11 : i64} {
  func.func @_finbert_kernel(%arg0: i32, %arg1: memref<8x32xf32, #tpu.memory_space<vmem>>, %arg2: memref<1x1x8xf32, #tpu.memory_space<vmem>>, %arg3: memref<2x32x96xbf16, #tpu.memory_space<vmem>>, %arg4: memref<2x32x32xbf16, #tpu.memory_space<vmem>>, %arg5: memref<2x32x64xbf16, #tpu.memory_space<vmem>>, %arg6: memref<2x64x32xbf16, #tpu.memory_space<vmem>>, %arg7: memref<2x8x96xf32, #tpu.memory_space<vmem>>, %arg8: memref<4x32xf32, #tpu.memory_space<vmem>>, %arg9: memref<32x32xbf16, #tpu.memory_space<vmem>>, %arg10: memref<32x2xbf16, #tpu.memory_space<vmem>>, %arg11: memref<1x1x2xf32, #tpu.memory_space<vmem>>) attributes {dimension_semantics = [#tpu.dimension_semantics<parallel>], iteration_bounds = array<i64: 2>, scalar_prefetch = 0 : i64, scratch_operands = 0 : i64, tpu.core_type = #tpu.core_type<tc>, window_params = [{transform_indices = @transform_0, window_bounds = array<i64: 8, 32>}, {transform_indices = @transform_1, window_bounds = array<i64: 1, 1, 8>}, {pipeline_mode = #tpu.pipeline_mode<synchronous>, transform_indices = @transform_2, window_bounds = array<i64: 2, 32, 96>}, {pipeline_mode = #tpu.pipeline_mode<synchronous>, transform_indices = @transform_3, window_bounds = array<i64: 2, 32, 32>}, {pipeline_mode = #tpu.pipeline_mode<synchronous>, transform_indices = @transform_4, window_bounds = array<i64: 2, 32, 64>}, {pipeline_mode = #tpu.pipeline_mode<synchronous>, transform_indices = @transform_5, window_bounds = array<i64: 2, 64, 32>}, {pipeline_mode = #tpu.pipeline_mode<synchronous>, transform_indices = @transform_6, window_bounds = array<i64: 2, 8, 96>}, {pipeline_mode = #tpu.pipeline_mode<synchronous>, transform_indices = @transform_7, window_bounds = array<i64: 4, 32>}, {pipeline_mode = #tpu.pipeline_mode<synchronous>, transform_indices = @transform_8, window_bounds = array<i64: 32, 32>}, {pipeline_mode = #tpu.pipeline_mode<synchronous>, transform_indices = @transform_9, window_bounds = array<i64: 32, 2>}, {transform_indices = @transform_10, window_bounds = array<i64: 1, 1, 2>}]} {
    %c0 = arith.constant 0 : index
    %c0_0 = arith.constant 0 : index
    %0 = vector.load %arg8[%c0, %c0_0] : memref<4x32xf32, #tpu.memory_space<vmem>>, vector<1x32xf32>
    %c1 = arith.constant 1 : index
    %c0_1 = arith.constant 0 : index
    %1 = vector.load %arg8[%c1, %c0_1] : memref<4x32xf32, #tpu.memory_space<vmem>>, vector<1x32xf32>
    %c2 = arith.constant 2 : index
    %c0_2 = arith.constant 0 : index
    %2 = vector.load %arg8[%c2, %c0_2] : memref<4x32xf32, #tpu.memory_space<vmem>>, vector<1x32xf32>
    %c3 = arith.constant 3 : index
    %c0_3 = arith.constant 0 : index
    %3 = vector.load %arg8[%c3, %c0_3] : memref<4x32xf32, #tpu.memory_space<vmem>>, vector<1x2xf32>
    %c0_4 = arith.constant 0 : index
    %c0_5 = arith.constant 0 : index
    %4 = vector.load %arg1[%c0_4, %c0_5] : memref<8x32xf32, #tpu.memory_space<vmem>>, vector<8x32xf32>
    %cst = arith.constant dense<0.000000e+00> : vector<8xf32>
    %5 = vector.multi_reduction <add>, %4, %cst [1] : vector<8x32xf32> to vector<8xf32>
    %6 = vector.shape_cast %5 : vector<8xf32> to vector<8x1xf32>
    %cst_6 = arith.constant 3.200000e+01 : f32
    %7 = vector.broadcast %cst_6 : f32 to vector<8x1xf32>
    %8 = arith.divf %6, %7 : vector<8x1xf32>
    %9 = vector.broadcast %8 : vector<8x1xf32> to vector<8x32xf32>
    %10 = arith.subf %4, %9 : vector<8x32xf32>
    %11 = vector.broadcast %8 : vector<8x1xf32> to vector<8x32xf32>
    %12 = arith.subf %4, %11 : vector<8x32xf32>
    %13 = arith.mulf %10, %12 : vector<8x32xf32>
    %cst_7 = arith.constant dense<0.000000e+00> : vector<8xf32>
    %14 = vector.multi_reduction <add>, %13, %cst_7 [1] : vector<8x32xf32> to vector<8xf32>
    %15 = vector.shape_cast %14 : vector<8xf32> to vector<8x1xf32>
    %cst_8 = arith.constant 3.200000e+01 : f32
    %16 = vector.broadcast %cst_8 : f32 to vector<8x1xf32>
    %17 = arith.divf %15, %16 : vector<8x1xf32>
    %18 = vector.broadcast %8 : vector<8x1xf32> to vector<8x32xf32>
    %19 = arith.subf %4, %18 : vector<8x32xf32>
    %cst_9 = arith.constant 9.99999996E-13 : f32
    %20 = vector.broadcast %cst_9 : f32 to vector<8x1xf32>
    %21 = arith.addf %17, %20 : vector<8x1xf32>
    %22 = math.rsqrt %21 : vector<8x1xf32>
    %23 = vector.broadcast %22 : vector<8x1xf32> to vector<8x32xf32>
    %24 = arith.mulf %19, %23 : vector<8x32xf32>
    %25 = vector.broadcast %0 : vector<1x32xf32> to vector<8x32xf32>
    %26 = arith.mulf %24, %25 : vector<8x32xf32>
    %27 = vector.broadcast %1 : vector<1x32xf32> to vector<8x32xf32>
    %28 = arith.addf %26, %27 : vector<8x32xf32>
    %c0_10 = arith.constant 0 : index
    %c0_11 = arith.constant 0 : index
    %c0_12 = arith.constant 0 : index
    %29 = vector.load %arg7[%c0_10, %c0_11, %c0_12] : memref<2x8x96xf32, #tpu.memory_space<vmem>>, vector<1x1x96xf32>
    %30 = vector.shape_cast %29 : vector<1x1x96xf32> to vector<1x96xf32>
    %c0_13 = arith.constant 0 : index
    %c1_14 = arith.constant 1 : index
    %c0_15 = arith.constant 0 : index
    %31 = vector.load %arg7[%c0_13, %c1_14, %c0_15] : memref<2x8x96xf32, #tpu.memory_space<vmem>>, vector<1x1x32xf32>
    %32 = vector.shape_cast %31 : vector<1x1x32xf32> to vector<1x32xf32>
    %c0_16 = arith.constant 0 : index
    %c2_17 = arith.constant 2 : index
    %c0_18 = arith.constant 0 : index
    %33 = vector.load %arg7[%c0_16, %c2_17, %c0_18] : memref<2x8x96xf32, #tpu.memory_space<vmem>>, vector<1x1x32xf32>
    %34 = vector.shape_cast %33 : vector<1x1x32xf32> to vector<1x32xf32>
    %c0_19 = arith.constant 0 : index
    %c3_20 = arith.constant 3 : index
    %c0_21 = arith.constant 0 : index
    %35 = vector.load %arg7[%c0_19, %c3_20, %c0_21] : memref<2x8x96xf32, #tpu.memory_space<vmem>>, vector<1x1x32xf32>
    %36 = vector.shape_cast %35 : vector<1x1x32xf32> to vector<1x32xf32>
    %c0_22 = arith.constant 0 : index
    %c4 = arith.constant 4 : index
    %c0_23 = arith.constant 0 : index
    %37 = vector.load %arg7[%c0_22, %c4, %c0_23] : memref<2x8x96xf32, #tpu.memory_space<vmem>>, vector<1x1x64xf32>
    %38 = vector.shape_cast %37 : vector<1x1x64xf32> to vector<1x64xf32>
    %c0_24 = arith.constant 0 : index
    %c5 = arith.constant 5 : index
    %c0_25 = arith.constant 0 : index
    %39 = vector.load %arg7[%c0_24, %c5, %c0_25] : memref<2x8x96xf32, #tpu.memory_space<vmem>>, vector<1x1x32xf32>
    %40 = vector.shape_cast %39 : vector<1x1x32xf32> to vector<1x32xf32>
    %c0_26 = arith.constant 0 : index
    %c6 = arith.constant 6 : index
    %c0_27 = arith.constant 0 : index
    %41 = vector.load %arg7[%c0_26, %c6, %c0_27] : memref<2x8x96xf32, #tpu.memory_space<vmem>>, vector<1x1x32xf32>
    %42 = vector.shape_cast %41 : vector<1x1x32xf32> to vector<1x32xf32>
    %c0_28 = arith.constant 0 : index
    %c7 = arith.constant 7 : index
    %c0_29 = arith.constant 0 : index
    %43 = vector.load %arg7[%c0_28, %c7, %c0_29] : memref<2x8x96xf32, #tpu.memory_space<vmem>>, vector<1x1x32xf32>
    %44 = vector.shape_cast %43 : vector<1x1x32xf32> to vector<1x32xf32>
    %45 = arith.truncf %28 : vector<8x32xf32> to vector<8x32xbf16>
    %c0_30 = arith.constant 0 : index
    %c0_31 = arith.constant 0 : index
    %c0_32 = arith.constant 0 : index
    %46 = vector.load %arg3[%c0_30, %c0_31, %c0_32] : memref<2x32x96xbf16, #tpu.memory_space<vmem>>, vector<1x32x96xbf16>
    %47 = vector.shape_cast %46 : vector<1x32x96xbf16> to vector<32x96xbf16>
    %cst_33 = arith.constant dense<0.000000e+00> : vector<8x96xf32>
    %48 = tpu.matmul %45, %47, %cst_33 {dimension_numbers = #tpu.dot_dimension_numbers<[1], [0], [0], [1], [0, 0, 1, 1], [], []>} : vector<8x32xbf16>, vector<32x96xbf16>, vector<8x96xf32> -> vector<8x96xf32>
    %49 = vector.broadcast %30 : vector<1x96xf32> to vector<8x96xf32>
    %50 = arith.addf %48, %49 : vector<8x96xf32>
    %51 = arith.truncf %50 : vector<8x96xf32> to vector<8x96xbf16>
    %c0_34 = arith.constant 0 : index
    %c0_35 = arith.constant 0 : index
    %c0_36 = arith.constant 0 : index
    %52 = vector.load %arg2[%c0_34, %c0_35, %c0_36] : memref<1x1x8xf32, #tpu.memory_space<vmem>>, vector<1x1x8xf32>
    %53 = vector.shape_cast %52 : vector<1x1x8xf32> to vector<1x8xf32>
    %54 = vector.extract_strided_slice %51 {offsets = [0, 0], sizes = [8, 16], strides = [1, 1]} : vector<8x96xbf16> to vector<8x16xbf16>
    %55 = vector.extract_strided_slice %51 {offsets = [0, 32], sizes = [8, 16], strides = [1, 1]} : vector<8x96xbf16> to vector<8x16xbf16>
    %56 = vector.extract_strided_slice %51 {offsets = [0, 64], sizes = [8, 16], strides = [1, 1]} : vector<8x96xbf16> to vector<8x16xbf16>
    %cst_37 = arith.constant dense<0.000000e+00> : vector<8x8xf32>
    %57 = tpu.matmul %54, %55, %cst_37 {dimension_numbers = #tpu.dot_dimension_numbers<[1], [1], [0], [0], [0, 0, 1, 0], [], []>} : vector<8x16xbf16>, vector<8x16xbf16>, vector<8x8xf32> -> vector<8x8xf32>
    %cst_38 = arith.constant 2.500000e-01 : f32
    %58 = vector.broadcast %cst_38 : f32 to vector<8x8xf32>
    %59 = arith.mulf %57, %58 : vector<8x8xf32>
    %60 = vector.broadcast %53 : vector<1x8xf32> to vector<8x8xf32>
    %61 = arith.addf %59, %60 : vector<8x8xf32>
    %cst_39 = arith.constant dense<0xFF800000> : vector<8xf32>
    %62 = vector.multi_reduction <maximumf>, %61, %cst_39 [1] : vector<8x8xf32> to vector<8xf32>
    %63 = vector.shape_cast %62 : vector<8xf32> to vector<8x1xf32>
    %64 = vector.broadcast %63 : vector<8x1xf32> to vector<8x8xf32>
    %65 = arith.subf %61, %64 : vector<8x8xf32>
    %66 = math.exp %65 : vector<8x8xf32>
    %cst_40 = arith.constant dense<0.000000e+00> : vector<8xf32>
    %67 = vector.multi_reduction <add>, %66, %cst_40 [1] : vector<8x8xf32> to vector<8xf32>
    %68 = vector.shape_cast %67 : vector<8xf32> to vector<8x1xf32>
    %69 = tpu.reciprocal %68 {approx = true} : vector<8x1xf32> -> vector<8x1xf32>
    %70 = vector.broadcast %69 : vector<8x1xf32> to vector<8x8xf32>
    %71 = arith.mulf %66, %70 : vector<8x8xf32>
    %72 = arith.truncf %71 : vector<8x8xf32> to vector<8x8xbf16>
    %cst_41 = arith.constant dense<0.000000e+00> : vector<8x16xf32>
    %73 = tpu.matmul %72, %56, %cst_41 {dimension_numbers = #tpu.dot_dimension_numbers<[1], [0], [0], [1], [0, 0, 1, 1], [], []>} : vector<8x8xbf16>, vector<8x16xbf16>, vector<8x16xf32> -> vector<8x16xf32>
    %74 = vector.extract_strided_slice %51 {offsets = [0, 16], sizes = [8, 16], strides = [1, 1]} : vector<8x96xbf16> to vector<8x16xbf16>
    %75 = vector.extract_strided_slice %51 {offsets = [0, 48], sizes = [8, 16], strides = [1, 1]} : vector<8x96xbf16> to vector<8x16xbf16>
    %76 = vector.extract_strided_slice %51 {offsets = [0, 80], sizes = [8, 16], strides = [1, 1]} : vector<8x96xbf16> to vector<8x16xbf16>
    %cst_42 = arith.constant dense<0.000000e+00> : vector<8x8xf32>
    %77 = tpu.matmul %74, %75, %cst_42 {dimension_numbers = #tpu.dot_dimension_numbers<[1], [1], [0], [0], [0, 0, 1, 0], [], []>} : vector<8x16xbf16>, vector<8x16xbf16>, vector<8x8xf32> -> vector<8x8xf32>
    %cst_43 = arith.constant 2.500000e-01 : f32
    %78 = vector.broadcast %cst_43 : f32 to vector<8x8xf32>
    %79 = arith.mulf %77, %78 : vector<8x8xf32>
    %80 = vector.broadcast %53 : vector<1x8xf32> to vector<8x8xf32>
    %81 = arith.addf %79, %80 : vector<8x8xf32>
    %cst_44 = arith.constant dense<0xFF800000> : vector<8xf32>
    %82 = vector.multi_reduction <maximumf>, %81, %cst_44 [1] : vector<8x8xf32> to vector<8xf32>
    %83 = vector.shape_cast %82 : vector<8xf32> to vector<8x1xf32>
    %84 = vector.broadcast %83 : vector<8x1xf32> to vector<8x8xf32>
    %85 = arith.subf %81, %84 : vector<8x8xf32>
    %86 = math.exp %85 : vector<8x8xf32>
    %cst_45 = arith.constant dense<0.000000e+00> : vector<8xf32>
    %87 = vector.multi_reduction <add>, %86, %cst_45 [1] : vector<8x8xf32> to vector<8xf32>
    %88 = vector.shape_cast %87 : vector<8xf32> to vector<8x1xf32>
    %89 = tpu.reciprocal %88 {approx = true} : vector<8x1xf32> -> vector<8x1xf32>
    %90 = vector.broadcast %89 : vector<8x1xf32> to vector<8x8xf32>
    %91 = arith.mulf %86, %90 : vector<8x8xf32>
    %92 = arith.truncf %91 : vector<8x8xf32> to vector<8x8xbf16>
    %cst_46 = arith.constant dense<0.000000e+00> : vector<8x16xf32>
    %93 = tpu.matmul %92, %76, %cst_46 {dimension_numbers = #tpu.dot_dimension_numbers<[1], [0], [0], [1], [0, 0, 1, 1], [], []>} : vector<8x8xbf16>, vector<8x16xbf16>, vector<8x16xf32> -> vector<8x16xf32>
    %94 = tpu.concatenate %73, %93 in 1 : vector<8x16xf32>, vector<8x16xf32> -> vector<8x32xf32>
    %95 = arith.truncf %94 : vector<8x32xf32> to vector<8x32xbf16>
    %c0_47 = arith.constant 0 : index
    %c0_48 = arith.constant 0 : index
    %c0_49 = arith.constant 0 : index
    %96 = vector.load %arg4[%c0_47, %c0_48, %c0_49] : memref<2x32x32xbf16, #tpu.memory_space<vmem>>, vector<1x32x32xbf16>
    %97 = vector.shape_cast %96 : vector<1x32x32xbf16> to vector<32x32xbf16>
    %cst_50 = arith.constant dense<0.000000e+00> : vector<8x32xf32>
    %98 = tpu.matmul %95, %97, %cst_50 {dimension_numbers = #tpu.dot_dimension_numbers<[1], [0], [0], [1], [0, 0, 1, 1], [], []>} : vector<8x32xbf16>, vector<32x32xbf16>, vector<8x32xf32> -> vector<8x32xf32>
    %99 = vector.broadcast %32 : vector<1x32xf32> to vector<8x32xf32>
    %100 = arith.addf %98, %99 : vector<8x32xf32>
    %101 = arith.addf %28, %100 : vector<8x32xf32>
    %cst_51 = arith.constant dense<0.000000e+00> : vector<8xf32>
    %102 = vector.multi_reduction <add>, %101, %cst_51 [1] : vector<8x32xf32> to vector<8xf32>
    %103 = vector.shape_cast %102 : vector<8xf32> to vector<8x1xf32>
    %cst_52 = arith.constant 3.200000e+01 : f32
    %104 = vector.broadcast %cst_52 : f32 to vector<8x1xf32>
    %105 = arith.divf %103, %104 : vector<8x1xf32>
    %106 = vector.broadcast %105 : vector<8x1xf32> to vector<8x32xf32>
    %107 = arith.subf %101, %106 : vector<8x32xf32>
    %108 = vector.broadcast %105 : vector<8x1xf32> to vector<8x32xf32>
    %109 = arith.subf %101, %108 : vector<8x32xf32>
    %110 = arith.mulf %107, %109 : vector<8x32xf32>
    %cst_53 = arith.constant dense<0.000000e+00> : vector<8xf32>
    %111 = vector.multi_reduction <add>, %110, %cst_53 [1] : vector<8x32xf32> to vector<8xf32>
    %112 = vector.shape_cast %111 : vector<8xf32> to vector<8x1xf32>
    %cst_54 = arith.constant 3.200000e+01 : f32
    %113 = vector.broadcast %cst_54 : f32 to vector<8x1xf32>
    %114 = arith.divf %112, %113 : vector<8x1xf32>
    %115 = vector.broadcast %105 : vector<8x1xf32> to vector<8x32xf32>
    %116 = arith.subf %101, %115 : vector<8x32xf32>
    %cst_55 = arith.constant 9.99999996E-13 : f32
    %117 = vector.broadcast %cst_55 : f32 to vector<8x1xf32>
    %118 = arith.addf %114, %117 : vector<8x1xf32>
    %119 = math.rsqrt %118 : vector<8x1xf32>
    %120 = vector.broadcast %119 : vector<8x1xf32> to vector<8x32xf32>
    %121 = arith.mulf %116, %120 : vector<8x32xf32>
    %122 = vector.broadcast %34 : vector<1x32xf32> to vector<8x32xf32>
    %123 = arith.mulf %121, %122 : vector<8x32xf32>
    %124 = vector.broadcast %36 : vector<1x32xf32> to vector<8x32xf32>
    %125 = arith.addf %123, %124 : vector<8x32xf32>
    %126 = arith.truncf %125 : vector<8x32xf32> to vector<8x32xbf16>
    %c0_56 = arith.constant 0 : index
    %c0_57 = arith.constant 0 : index
    %c0_58 = arith.constant 0 : index
    %127 = vector.load %arg5[%c0_56, %c0_57, %c0_58] : memref<2x32x64xbf16, #tpu.memory_space<vmem>>, vector<1x32x64xbf16>
    %128 = vector.shape_cast %127 : vector<1x32x64xbf16> to vector<32x64xbf16>
    %cst_59 = arith.constant dense<0.000000e+00> : vector<8x64xf32>
    %129 = tpu.matmul %126, %128, %cst_59 {dimension_numbers = #tpu.dot_dimension_numbers<[1], [0], [0], [1], [0, 0, 1, 1], [], []>} : vector<8x32xbf16>, vector<32x64xbf16>, vector<8x64xf32> -> vector<8x64xf32>
    %130 = vector.broadcast %38 : vector<1x64xf32> to vector<8x64xf32>
    %131 = arith.addf %129, %130 : vector<8x64xf32>
    %cst_60 = arith.constant 5.000000e-01 : f32
    %132 = vector.broadcast %cst_60 : f32 to vector<8x64xf32>
    %133 = arith.mulf %132, %131 : vector<8x64xf32>
    %cst_61 = arith.constant 4.471500e-02 : f32
    %134 = vector.broadcast %cst_61 : f32 to vector<8x64xf32>
    %135 = arith.mulf %134, %131 : vector<8x64xf32>
    %136 = arith.mulf %135, %131 : vector<8x64xf32>
    %137 = arith.mulf %136, %131 : vector<8x64xf32>
    %138 = arith.addf %131, %137 : vector<8x64xf32>
    %cst_62 = arith.constant 0.797884583 : f32
    %139 = vector.broadcast %cst_62 : f32 to vector<8x64xf32>
    %140 = arith.mulf %139, %138 : vector<8x64xf32>
    %141 = math.tanh %140 : vector<8x64xf32>
    %cst_63 = arith.constant 1.000000e+00 : f32
    %142 = vector.broadcast %cst_63 : f32 to vector<8x64xf32>
    %143 = arith.addf %142, %141 : vector<8x64xf32>
    %144 = arith.mulf %133, %143 : vector<8x64xf32>
    %145 = arith.truncf %144 : vector<8x64xf32> to vector<8x64xbf16>
    %c0_64 = arith.constant 0 : index
    %c0_65 = arith.constant 0 : index
    %c0_66 = arith.constant 0 : index
    %146 = vector.load %arg6[%c0_64, %c0_65, %c0_66] : memref<2x64x32xbf16, #tpu.memory_space<vmem>>, vector<1x64x32xbf16>
    %147 = vector.shape_cast %146 : vector<1x64x32xbf16> to vector<64x32xbf16>
    %cst_67 = arith.constant dense<0.000000e+00> : vector<8x32xf32>
    %148 = tpu.matmul %145, %147, %cst_67 {dimension_numbers = #tpu.dot_dimension_numbers<[1], [0], [0], [1], [0, 0, 1, 1], [], []>} : vector<8x64xbf16>, vector<64x32xbf16>, vector<8x32xf32> -> vector<8x32xf32>
    %149 = vector.broadcast %40 : vector<1x32xf32> to vector<8x32xf32>
    %150 = arith.addf %148, %149 : vector<8x32xf32>
    %151 = arith.addf %125, %150 : vector<8x32xf32>
    %cst_68 = arith.constant dense<0.000000e+00> : vector<8xf32>
    %152 = vector.multi_reduction <add>, %151, %cst_68 [1] : vector<8x32xf32> to vector<8xf32>
    %153 = vector.shape_cast %152 : vector<8xf32> to vector<8x1xf32>
    %cst_69 = arith.constant 3.200000e+01 : f32
    %154 = vector.broadcast %cst_69 : f32 to vector<8x1xf32>
    %155 = arith.divf %153, %154 : vector<8x1xf32>
    %156 = vector.broadcast %155 : vector<8x1xf32> to vector<8x32xf32>
    %157 = arith.subf %151, %156 : vector<8x32xf32>
    %158 = vector.broadcast %155 : vector<8x1xf32> to vector<8x32xf32>
    %159 = arith.subf %151, %158 : vector<8x32xf32>
    %160 = arith.mulf %157, %159 : vector<8x32xf32>
    %cst_70 = arith.constant dense<0.000000e+00> : vector<8xf32>
    %161 = vector.multi_reduction <add>, %160, %cst_70 [1] : vector<8x32xf32> to vector<8xf32>
    %162 = vector.shape_cast %161 : vector<8xf32> to vector<8x1xf32>
    %cst_71 = arith.constant 3.200000e+01 : f32
    %163 = vector.broadcast %cst_71 : f32 to vector<8x1xf32>
    %164 = arith.divf %162, %163 : vector<8x1xf32>
    %165 = vector.broadcast %155 : vector<8x1xf32> to vector<8x32xf32>
    %166 = arith.subf %151, %165 : vector<8x32xf32>
    %cst_72 = arith.constant 9.99999996E-13 : f32
    %167 = vector.broadcast %cst_72 : f32 to vector<8x1xf32>
    %168 = arith.addf %164, %167 : vector<8x1xf32>
    %169 = math.rsqrt %168 : vector<8x1xf32>
    %170 = vector.broadcast %169 : vector<8x1xf32> to vector<8x32xf32>
    %171 = arith.mulf %166, %170 : vector<8x32xf32>
    %172 = vector.broadcast %42 : vector<1x32xf32> to vector<8x32xf32>
    %173 = arith.mulf %171, %172 : vector<8x32xf32>
    %174 = vector.broadcast %44 : vector<1x32xf32> to vector<8x32xf32>
    %175 = arith.addf %173, %174 : vector<8x32xf32>
    %c1_73 = arith.constant 1 : index
    %c0_74 = arith.constant 0 : index
    %c0_75 = arith.constant 0 : index
    %176 = vector.load %arg7[%c1_73, %c0_74, %c0_75] : memref<2x8x96xf32, #tpu.memory_space<vmem>>, vector<1x1x96xf32>
    %177 = vector.shape_cast %176 : vector<1x1x96xf32> to vector<1x96xf32>
    %c1_76 = arith.constant 1 : index
    %c1_77 = arith.constant 1 : index
    %c0_78 = arith.constant 0 : index
    %178 = vector.load %arg7[%c1_76, %c1_77, %c0_78] : memref<2x8x96xf32, #tpu.memory_space<vmem>>, vector<1x1x32xf32>
    %179 = vector.shape_cast %178 : vector<1x1x32xf32> to vector<1x32xf32>
    %c1_79 = arith.constant 1 : index
    %c2_80 = arith.constant 2 : index
    %c0_81 = arith.constant 0 : index
    %180 = vector.load %arg7[%c1_79, %c2_80, %c0_81] : memref<2x8x96xf32, #tpu.memory_space<vmem>>, vector<1x1x32xf32>
    %181 = vector.shape_cast %180 : vector<1x1x32xf32> to vector<1x32xf32>
    %c1_82 = arith.constant 1 : index
    %c3_83 = arith.constant 3 : index
    %c0_84 = arith.constant 0 : index
    %182 = vector.load %arg7[%c1_82, %c3_83, %c0_84] : memref<2x8x96xf32, #tpu.memory_space<vmem>>, vector<1x1x32xf32>
    %183 = vector.shape_cast %182 : vector<1x1x32xf32> to vector<1x32xf32>
    %c1_85 = arith.constant 1 : index
    %c4_86 = arith.constant 4 : index
    %c0_87 = arith.constant 0 : index
    %184 = vector.load %arg7[%c1_85, %c4_86, %c0_87] : memref<2x8x96xf32, #tpu.memory_space<vmem>>, vector<1x1x64xf32>
    %185 = vector.shape_cast %184 : vector<1x1x64xf32> to vector<1x64xf32>
    %c1_88 = arith.constant 1 : index
    %c5_89 = arith.constant 5 : index
    %c0_90 = arith.constant 0 : index
    %186 = vector.load %arg7[%c1_88, %c5_89, %c0_90] : memref<2x8x96xf32, #tpu.memory_space<vmem>>, vector<1x1x32xf32>
    %187 = vector.shape_cast %186 : vector<1x1x32xf32> to vector<1x32xf32>
    %c1_91 = arith.constant 1 : index
    %c6_92 = arith.constant 6 : index
    %c0_93 = arith.constant 0 : index
    %188 = vector.load %arg7[%c1_91, %c6_92, %c0_93] : memref<2x8x96xf32, #tpu.memory_space<vmem>>, vector<1x1x32xf32>
    %189 = vector.shape_cast %188 : vector<1x1x32xf32> to vector<1x32xf32>
    %c1_94 = arith.constant 1 : index
    %c7_95 = arith.constant 7 : index
    %c0_96 = arith.constant 0 : index
    %190 = vector.load %arg7[%c1_94, %c7_95, %c0_96] : memref<2x8x96xf32, #tpu.memory_space<vmem>>, vector<1x1x32xf32>
    %191 = vector.shape_cast %190 : vector<1x1x32xf32> to vector<1x32xf32>
    %192 = arith.truncf %175 : vector<8x32xf32> to vector<8x32xbf16>
    %c1_97 = arith.constant 1 : index
    %c0_98 = arith.constant 0 : index
    %c0_99 = arith.constant 0 : index
    %193 = vector.load %arg3[%c1_97, %c0_98, %c0_99] : memref<2x32x96xbf16, #tpu.memory_space<vmem>>, vector<1x32x96xbf16>
    %194 = vector.shape_cast %193 : vector<1x32x96xbf16> to vector<32x96xbf16>
    %cst_100 = arith.constant dense<0.000000e+00> : vector<8x96xf32>
    %195 = tpu.matmul %192, %194, %cst_100 {dimension_numbers = #tpu.dot_dimension_numbers<[1], [0], [0], [1], [0, 0, 1, 1], [], []>} : vector<8x32xbf16>, vector<32x96xbf16>, vector<8x96xf32> -> vector<8x96xf32>
    %196 = vector.broadcast %177 : vector<1x96xf32> to vector<8x96xf32>
    %197 = arith.addf %195, %196 : vector<8x96xf32>
    %198 = arith.truncf %197 : vector<8x96xf32> to vector<8x96xbf16>
    %c0_101 = arith.constant 0 : index
    %c0_102 = arith.constant 0 : index
    %c0_103 = arith.constant 0 : index
    %199 = vector.load %arg2[%c0_101, %c0_102, %c0_103] : memref<1x1x8xf32, #tpu.memory_space<vmem>>, vector<1x1x8xf32>
    %200 = vector.shape_cast %199 : vector<1x1x8xf32> to vector<1x8xf32>
    %201 = vector.extract_strided_slice %198 {offsets = [0, 0], sizes = [8, 16], strides = [1, 1]} : vector<8x96xbf16> to vector<8x16xbf16>
    %202 = vector.extract_strided_slice %198 {offsets = [0, 32], sizes = [8, 16], strides = [1, 1]} : vector<8x96xbf16> to vector<8x16xbf16>
    %203 = vector.extract_strided_slice %198 {offsets = [0, 64], sizes = [8, 16], strides = [1, 1]} : vector<8x96xbf16> to vector<8x16xbf16>
    %cst_104 = arith.constant dense<0.000000e+00> : vector<8x8xf32>
    %204 = tpu.matmul %201, %202, %cst_104 {dimension_numbers = #tpu.dot_dimension_numbers<[1], [1], [0], [0], [0, 0, 1, 0], [], []>} : vector<8x16xbf16>, vector<8x16xbf16>, vector<8x8xf32> -> vector<8x8xf32>
    %cst_105 = arith.constant 2.500000e-01 : f32
    %205 = vector.broadcast %cst_105 : f32 to vector<8x8xf32>
    %206 = arith.mulf %204, %205 : vector<8x8xf32>
    %207 = vector.broadcast %200 : vector<1x8xf32> to vector<8x8xf32>
    %208 = arith.addf %206, %207 : vector<8x8xf32>
    %cst_106 = arith.constant dense<0xFF800000> : vector<8xf32>
    %209 = vector.multi_reduction <maximumf>, %208, %cst_106 [1] : vector<8x8xf32> to vector<8xf32>
    %210 = vector.shape_cast %209 : vector<8xf32> to vector<8x1xf32>
    %211 = vector.broadcast %210 : vector<8x1xf32> to vector<8x8xf32>
    %212 = arith.subf %208, %211 : vector<8x8xf32>
    %213 = math.exp %212 : vector<8x8xf32>
    %cst_107 = arith.constant dense<0.000000e+00> : vector<8xf32>
    %214 = vector.multi_reduction <add>, %213, %cst_107 [1] : vector<8x8xf32> to vector<8xf32>
    %215 = vector.shape_cast %214 : vector<8xf32> to vector<8x1xf32>
    %216 = tpu.reciprocal %215 {approx = true} : vector<8x1xf32> -> vector<8x1xf32>
    %217 = vector.broadcast %216 : vector<8x1xf32> to vector<8x8xf32>
    %218 = arith.mulf %213, %217 : vector<8x8xf32>
    %219 = arith.truncf %218 : vector<8x8xf32> to vector<8x8xbf16>
    %cst_108 = arith.constant dense<0.000000e+00> : vector<8x16xf32>
    %220 = tpu.matmul %219, %203, %cst_108 {dimension_numbers = #tpu.dot_dimension_numbers<[1], [0], [0], [1], [0, 0, 1, 1], [], []>} : vector<8x8xbf16>, vector<8x16xbf16>, vector<8x16xf32> -> vector<8x16xf32>
    %221 = vector.extract_strided_slice %198 {offsets = [0, 16], sizes = [8, 16], strides = [1, 1]} : vector<8x96xbf16> to vector<8x16xbf16>
    %222 = vector.extract_strided_slice %198 {offsets = [0, 48], sizes = [8, 16], strides = [1, 1]} : vector<8x96xbf16> to vector<8x16xbf16>
    %223 = vector.extract_strided_slice %198 {offsets = [0, 80], sizes = [8, 16], strides = [1, 1]} : vector<8x96xbf16> to vector<8x16xbf16>
    %cst_109 = arith.constant dense<0.000000e+00> : vector<8x8xf32>
    %224 = tpu.matmul %221, %222, %cst_109 {dimension_numbers = #tpu.dot_dimension_numbers<[1], [1], [0], [0], [0, 0, 1, 0], [], []>} : vector<8x16xbf16>, vector<8x16xbf16>, vector<8x8xf32> -> vector<8x8xf32>
    %cst_110 = arith.constant 2.500000e-01 : f32
    %225 = vector.broadcast %cst_110 : f32 to vector<8x8xf32>
    %226 = arith.mulf %224, %225 : vector<8x8xf32>
    %227 = vector.broadcast %200 : vector<1x8xf32> to vector<8x8xf32>
    %228 = arith.addf %226, %227 : vector<8x8xf32>
    %cst_111 = arith.constant dense<0xFF800000> : vector<8xf32>
    %229 = vector.multi_reduction <maximumf>, %228, %cst_111 [1] : vector<8x8xf32> to vector<8xf32>
    %230 = vector.shape_cast %229 : vector<8xf32> to vector<8x1xf32>
    %231 = vector.broadcast %230 : vector<8x1xf32> to vector<8x8xf32>
    %232 = arith.subf %228, %231 : vector<8x8xf32>
    %233 = math.exp %232 : vector<8x8xf32>
    %cst_112 = arith.constant dense<0.000000e+00> : vector<8xf32>
    %234 = vector.multi_reduction <add>, %233, %cst_112 [1] : vector<8x8xf32> to vector<8xf32>
    %235 = vector.shape_cast %234 : vector<8xf32> to vector<8x1xf32>
    %236 = tpu.reciprocal %235 {approx = true} : vector<8x1xf32> -> vector<8x1xf32>
    %237 = vector.broadcast %236 : vector<8x1xf32> to vector<8x8xf32>
    %238 = arith.mulf %233, %237 : vector<8x8xf32>
    %239 = arith.truncf %238 : vector<8x8xf32> to vector<8x8xbf16>
    %cst_113 = arith.constant dense<0.000000e+00> : vector<8x16xf32>
    %240 = tpu.matmul %239, %223, %cst_113 {dimension_numbers = #tpu.dot_dimension_numbers<[1], [0], [0], [1], [0, 0, 1, 1], [], []>} : vector<8x8xbf16>, vector<8x16xbf16>, vector<8x16xf32> -> vector<8x16xf32>
    %241 = tpu.concatenate %220, %240 in 1 : vector<8x16xf32>, vector<8x16xf32> -> vector<8x32xf32>
    %242 = arith.truncf %241 : vector<8x32xf32> to vector<8x32xbf16>
    %c1_114 = arith.constant 1 : index
    %c0_115 = arith.constant 0 : index
    %c0_116 = arith.constant 0 : index
    %243 = vector.load %arg4[%c1_114, %c0_115, %c0_116] : memref<2x32x32xbf16, #tpu.memory_space<vmem>>, vector<1x32x32xbf16>
    %244 = vector.shape_cast %243 : vector<1x32x32xbf16> to vector<32x32xbf16>
    %cst_117 = arith.constant dense<0.000000e+00> : vector<8x32xf32>
    %245 = tpu.matmul %242, %244, %cst_117 {dimension_numbers = #tpu.dot_dimension_numbers<[1], [0], [0], [1], [0, 0, 1, 1], [], []>} : vector<8x32xbf16>, vector<32x32xbf16>, vector<8x32xf32> -> vector<8x32xf32>
    %246 = vector.broadcast %179 : vector<1x32xf32> to vector<8x32xf32>
    %247 = arith.addf %245, %246 : vector<8x32xf32>
    %248 = arith.addf %175, %247 : vector<8x32xf32>
    %cst_118 = arith.constant dense<0.000000e+00> : vector<8xf32>
    %249 = vector.multi_reduction <add>, %248, %cst_118 [1] : vector<8x32xf32> to vector<8xf32>
    %250 = vector.shape_cast %249 : vector<8xf32> to vector<8x1xf32>
    %cst_119 = arith.constant 3.200000e+01 : f32
    %251 = vector.broadcast %cst_119 : f32 to vector<8x1xf32>
    %252 = arith.divf %250, %251 : vector<8x1xf32>
    %253 = vector.broadcast %252 : vector<8x1xf32> to vector<8x32xf32>
    %254 = arith.subf %248, %253 : vector<8x32xf32>
    %255 = vector.broadcast %252 : vector<8x1xf32> to vector<8x32xf32>
    %256 = arith.subf %248, %255 : vector<8x32xf32>
    %257 = arith.mulf %254, %256 : vector<8x32xf32>
    %cst_120 = arith.constant dense<0.000000e+00> : vector<8xf32>
    %258 = vector.multi_reduction <add>, %257, %cst_120 [1] : vector<8x32xf32> to vector<8xf32>
    %259 = vector.shape_cast %258 : vector<8xf32> to vector<8x1xf32>
    %cst_121 = arith.constant 3.200000e+01 : f32
    %260 = vector.broadcast %cst_121 : f32 to vector<8x1xf32>
    %261 = arith.divf %259, %260 : vector<8x1xf32>
    %262 = vector.broadcast %252 : vector<8x1xf32> to vector<8x32xf32>
    %263 = arith.subf %248, %262 : vector<8x32xf32>
    %cst_122 = arith.constant 9.99999996E-13 : f32
    %264 = vector.broadcast %cst_122 : f32 to vector<8x1xf32>
    %265 = arith.addf %261, %264 : vector<8x1xf32>
    %266 = math.rsqrt %265 : vector<8x1xf32>
    %267 = vector.broadcast %266 : vector<8x1xf32> to vector<8x32xf32>
    %268 = arith.mulf %263, %267 : vector<8x32xf32>
    %269 = vector.broadcast %181 : vector<1x32xf32> to vector<8x32xf32>
    %270 = arith.mulf %268, %269 : vector<8x32xf32>
    %271 = vector.broadcast %183 : vector<1x32xf32> to vector<8x32xf32>
    %272 = arith.addf %270, %271 : vector<8x32xf32>
    %273 = arith.truncf %272 : vector<8x32xf32> to vector<8x32xbf16>
    %c1_123 = arith.constant 1 : index
    %c0_124 = arith.constant 0 : index
    %c0_125 = arith.constant 0 : index
    %274 = vector.load %arg5[%c1_123, %c0_124, %c0_125] : memref<2x32x64xbf16, #tpu.memory_space<vmem>>, vector<1x32x64xbf16>
    %275 = vector.shape_cast %274 : vector<1x32x64xbf16> to vector<32x64xbf16>
    %cst_126 = arith.constant dense<0.000000e+00> : vector<8x64xf32>
    %276 = tpu.matmul %273, %275, %cst_126 {dimension_numbers = #tpu.dot_dimension_numbers<[1], [0], [0], [1], [0, 0, 1, 1], [], []>} : vector<8x32xbf16>, vector<32x64xbf16>, vector<8x64xf32> -> vector<8x64xf32>
    %277 = vector.broadcast %185 : vector<1x64xf32> to vector<8x64xf32>
    %278 = arith.addf %276, %277 : vector<8x64xf32>
    %cst_127 = arith.constant 5.000000e-01 : f32
    %279 = vector.broadcast %cst_127 : f32 to vector<8x64xf32>
    %280 = arith.mulf %279, %278 : vector<8x64xf32>
    %cst_128 = arith.constant 4.471500e-02 : f32
    %281 = vector.broadcast %cst_128 : f32 to vector<8x64xf32>
    %282 = arith.mulf %281, %278 : vector<8x64xf32>
    %283 = arith.mulf %282, %278 : vector<8x64xf32>
    %284 = arith.mulf %283, %278 : vector<8x64xf32>
    %285 = arith.addf %278, %284 : vector<8x64xf32>
    %cst_129 = arith.constant 0.797884583 : f32
    %286 = vector.broadcast %cst_129 : f32 to vector<8x64xf32>
    %287 = arith.mulf %286, %285 : vector<8x64xf32>
    %288 = math.tanh %287 : vector<8x64xf32>
    %cst_130 = arith.constant 1.000000e+00 : f32
    %289 = vector.broadcast %cst_130 : f32 to vector<8x64xf32>
    %290 = arith.addf %289, %288 : vector<8x64xf32>
    %291 = arith.mulf %280, %290 : vector<8x64xf32>
    %292 = arith.truncf %291 : vector<8x64xf32> to vector<8x64xbf16>
    %c1_131 = arith.constant 1 : index
    %c0_132 = arith.constant 0 : index
    %c0_133 = arith.constant 0 : index
    %293 = vector.load %arg6[%c1_131, %c0_132, %c0_133] : memref<2x64x32xbf16, #tpu.memory_space<vmem>>, vector<1x64x32xbf16>
    %294 = vector.shape_cast %293 : vector<1x64x32xbf16> to vector<64x32xbf16>
    %cst_134 = arith.constant dense<0.000000e+00> : vector<8x32xf32>
    %295 = tpu.matmul %292, %294, %cst_134 {dimension_numbers = #tpu.dot_dimension_numbers<[1], [0], [0], [1], [0, 0, 1, 1], [], []>} : vector<8x64xbf16>, vector<64x32xbf16>, vector<8x32xf32> -> vector<8x32xf32>
    %296 = vector.broadcast %187 : vector<1x32xf32> to vector<8x32xf32>
    %297 = arith.addf %295, %296 : vector<8x32xf32>
    %298 = arith.addf %272, %297 : vector<8x32xf32>
    %cst_135 = arith.constant dense<0.000000e+00> : vector<8xf32>
    %299 = vector.multi_reduction <add>, %298, %cst_135 [1] : vector<8x32xf32> to vector<8xf32>
    %300 = vector.shape_cast %299 : vector<8xf32> to vector<8x1xf32>
    %cst_136 = arith.constant 3.200000e+01 : f32
    %301 = vector.broadcast %cst_136 : f32 to vector<8x1xf32>
    %302 = arith.divf %300, %301 : vector<8x1xf32>
    %303 = vector.broadcast %302 : vector<8x1xf32> to vector<8x32xf32>
    %304 = arith.subf %298, %303 : vector<8x32xf32>
    %305 = vector.broadcast %302 : vector<8x1xf32> to vector<8x32xf32>
    %306 = arith.subf %298, %305 : vector<8x32xf32>
    %307 = arith.mulf %304, %306 : vector<8x32xf32>
    %cst_137 = arith.constant dense<0.000000e+00> : vector<8xf32>
    %308 = vector.multi_reduction <add>, %307, %cst_137 [1] : vector<8x32xf32> to vector<8xf32>
    %309 = vector.shape_cast %308 : vector<8xf32> to vector<8x1xf32>
    %cst_138 = arith.constant 3.200000e+01 : f32
    %310 = vector.broadcast %cst_138 : f32 to vector<8x1xf32>
    %311 = arith.divf %309, %310 : vector<8x1xf32>
    %312 = vector.broadcast %302 : vector<8x1xf32> to vector<8x32xf32>
    %313 = arith.subf %298, %312 : vector<8x32xf32>
    %cst_139 = arith.constant 9.99999996E-13 : f32
    %314 = vector.broadcast %cst_139 : f32 to vector<8x1xf32>
    %315 = arith.addf %311, %314 : vector<8x1xf32>
    %316 = math.rsqrt %315 : vector<8x1xf32>
    %317 = vector.broadcast %316 : vector<8x1xf32> to vector<8x32xf32>
    %318 = arith.mulf %313, %317 : vector<8x32xf32>
    %319 = vector.broadcast %189 : vector<1x32xf32> to vector<8x32xf32>
    %320 = arith.mulf %318, %319 : vector<8x32xf32>
    %321 = vector.broadcast %191 : vector<1x32xf32> to vector<8x32xf32>
    %322 = arith.addf %320, %321 : vector<8x32xf32>
    %323 = vector.extract_strided_slice %322 {offsets = [0, 0], sizes = [1, 32], strides = [1, 1]} : vector<8x32xf32> to vector<1x32xf32>
    %324 = arith.truncf %323 : vector<1x32xf32> to vector<1x32xbf16>
    %c0_140 = arith.constant 0 : index
    %c0_141 = arith.constant 0 : index
    %325 = vector.load %arg9[%c0_140, %c0_141] : memref<32x32xbf16, #tpu.memory_space<vmem>>, vector<32x32xbf16>
    %cst_142 = arith.constant dense<0.000000e+00> : vector<1x32xf32>
    %326 = tpu.matmul %324, %325, %cst_142 {dimension_numbers = #tpu.dot_dimension_numbers<[1], [0], [0], [1], [0, 0, 1, 1], [], []>} : vector<1x32xbf16>, vector<32x32xbf16>, vector<1x32xf32> -> vector<1x32xf32>
    %327 = arith.addf %326, %2 : vector<1x32xf32>
    %328 = math.tanh %327 : vector<1x32xf32>
    %329 = arith.truncf %328 : vector<1x32xf32> to vector<1x32xbf16>
    %c0_143 = arith.constant 0 : index
    %c0_144 = arith.constant 0 : index
    %330 = vector.load %arg10[%c0_143, %c0_144] : memref<32x2xbf16, #tpu.memory_space<vmem>>, vector<32x2xbf16>
    %cst_145 = arith.constant dense<0.000000e+00> : vector<1x2xf32>
    %331 = tpu.matmul %329, %330, %cst_145 {dimension_numbers = #tpu.dot_dimension_numbers<[1], [0], [0], [1], [0, 0, 1, 1], [], []>} : vector<1x32xbf16>, vector<32x2xbf16>, vector<1x2xf32> -> vector<1x2xf32>
    %332 = arith.addf %331, %3 : vector<1x2xf32>
    %c0_146 = arith.constant 0 : index
    %c0_147 = arith.constant 0 : index
    %c0_148 = arith.constant 0 : index
    %333 = vector.load %arg11[%c0_146, %c0_147, %c0_148] : memref<1x1x2xf32, #tpu.memory_space<vmem>>, vector<1x1x2xf32>
    %334 = vector.shape_cast %333 : vector<1x1x2xf32> to vector<1x2xf32>
    %335 = vector.shape_cast %332 : vector<1x2xf32> to vector<1x1x2xf32>
    tpu.vector_store %arg11[%c0_146, %c0_147, %c0_148], %335 {strides = array<i32>} : memref<1x1x2xf32, #tpu.memory_space<vmem>>, vector<1x1x2xf32>,
    return
  }
  func.func @transform_0(%arg0: i32) -> (i32, i32) {
    %c0_i32 = arith.constant 0 : i32
    %c0_i32_0 = arith.constant 0 : i32
    return %arg0, %c0_i32 : i32, i32
  }
  func.func @transform_1(%arg0: i32) -> (i32, i32, i32) {
    %c0_i32 = arith.constant 0 : i32
    %c0_i32_0 = arith.constant 0 : i32
    %c0_i32_1 = arith.constant 0 : i32
    return %arg0, %c0_i32, %c0_i32_0 : i32, i32, i32
  }
  func.func @transform_2(%arg0: i32) -> (i32, i32, i32) {
    %c0_i32 = arith.constant 0 : i32
    %c0_i32_0 = arith.constant 0 : i32
    %c0_i32_1 = arith.constant 0 : i32
    %c0_i32_2 = arith.constant 0 : i32
    return %c0_i32, %c0_i32_0, %c0_i32_1 : i32, i32, i32
  }
  func.func @transform_3(%arg0: i32) -> (i32, i32, i32) {
    %c0_i32 = arith.constant 0 : i32
    %c0_i32_0 = arith.constant 0 : i32
    %c0_i32_1 = arith.constant 0 : i32
    %c0_i32_2 = arith.constant 0 : i32
    return %c0_i32, %c0_i32_0, %c0_i32_1 : i32, i32, i32
  }
  func.func @transform_4(%arg0: i32) -> (i32, i32, i32) {
    %c0_i32 = arith.constant 0 : i32
    %c0_i32_0 = arith.constant 0 : i32
    %c0_i32_1 = arith.constant 0 : i32
    %c0_i32_2 = arith.constant 0 : i32
    return %c0_i32, %c0_i32_0, %c0_i32_1 : i32, i32, i32
  }
  func.func @transform_5(%arg0: i32) -> (i32, i32, i32) {
    %c0_i32 = arith.constant 0 : i32
    %c0_i32_0 = arith.constant 0 : i32
    %c0_i32_1 = arith.constant 0 : i32
    %c0_i32_2 = arith.constant 0 : i32
    return %c0_i32, %c0_i32_0, %c0_i32_1 : i32, i32, i32
  }
  func.func @transform_6(%arg0: i32) -> (i32, i32, i32) {
    %c0_i32 = arith.constant 0 : i32
    %c0_i32_0 = arith.constant 0 : i32
    %c0_i32_1 = arith.constant 0 : i32
    %c0_i32_2 = arith.constant 0 : i32
    return %c0_i32, %c0_i32_0, %c0_i32_1 : i32, i32, i32
  }
  func.func @transform_7(%arg0: i32) -> (i32, i32) {
    %c0_i32 = arith.constant 0 : i32
    %c0_i32_0 = arith.constant 0 : i32
    %c0_i32_1 = arith.constant 0 : i32
    return %c0_i32, %c0_i32_0 : i32, i32
  }
  func.func @transform_8(%arg0: i32) -> (i32, i32) {
    %c0_i32 = arith.constant 0 : i32
    %c0_i32_0 = arith.constant 0 : i32
    %c0_i32_1 = arith.constant 0 : i32
    return %c0_i32, %c0_i32_0 : i32, i32
  }
  func.func @transform_9(%arg0: i32) -> (i32, i32) {
    %c0_i32 = arith.constant 0 : i32
    %c0_i32_0 = arith.constant 0 : i32
    %c0_i32_1 = arith.constant 0 : i32
    return %c0_i32, %c0_i32_0 : i32, i32
  }
  func.func @transform_10(%arg0: i32) -> (i32, i32, i32) {
    %c0_i32 = arith.constant 0 : i32
    %c0_i32_0 = arith.constant 0 : i32
    %c0_i32_1 = arith.constant 0 : i32
    return %arg0, %c0_i32, %c0_i32_0 : i32, i32, i32
  }
}

</mosaic_0001>

<bundles_post_ra>
// kernel: tpu_custom_call.1
= control target key start
LH: loop header
LB: loop body
LE: loop exit
PB: predicated region body
PF: predicated region fallthrough
CT: control target
= control target key end

     0   :  { %15 = vsyncpa [#allocation3], 0  ;;  %s2926_s0 = inlined_call_operand.hbm [shape: f32[16,32], index: 0, kind: input, shape index: {}]   ;;  %s2927_s1 = inlined_call_operand.vmem [shape: f32[2,1,8], index: 1, kind: input, shape index: {}]   ;;  %s2928_s2 = inlined_call_operand.vmem [shape: bf16[2,32,96], index: 2, kind: input, shape index: {}]   ;;  %s2929_s3 = inlined_call_operand.vmem [shape: bf16[2,32,32], index: 3, kind: input, shape index: {}]   ;;  %s2930_s4 = inlined_call_operand.vmem [shape: bf16[2,32,64], index: 4, kind: input, shape index: {}]   ;;  %s2931_s5 = inlined_call_operand.vmem [shape: bf16[2,64,32], index: 5, kind: input, shape index: {}]   ;;  %s2932_s6 = inlined_call_operand.hbm [shape: f32[2,8,96], index: 6, kind: input, shape index: {}]   ;;  %s2933_s7 = inlined_call_operand.vmem [shape: f32[4,32], index: 7, kind: input, shape index: {}]   ;;  %s2934_s8 = inlined_call_operand.hbm [shape: bf16[32,32], index: 8, kind: input, shape index: {}]   ;;  %s2935_s9 = inlined_call_operand.vmem [shape: bf16[32,2], index: 9, kind: input, shape index: {}]   ;;  %s2936_s10 = inlined_call_operand.hbm [shape: f32[2,1,2], index: 10, kind: output, shape index: {}]  }
   0x1   :  { %17 = vsyncpa [#allocation3 + $0x1], 0 }
   0x2   :  { %18 = vsyncpa [#allocation6], 0 }
   0x3   :  { %19 = vsyncpa [#allocation4], 0 }
   0x4   :  { %21 = vsyncpa [#allocation4 + $0x1], 0  ;;  %s2471_s13 = smov 0   ;;  %s2473_s14 = smov 0  }
   0x5   :  { %s2475_s15 = smov 0   ;;  %s2477_s16 = smov 0  }
   0x6 LB: > { %2944 = sst [smem:[#allocation12_spill]] %s2386_s13  ;;  %s2492_s17 = sadd.s32 4294967295, %s2398_s16   ;;  %s2398_s16 = sphi %s2477_s16, %s2966_s16   ;;  %s2394_s15 = sphi %s2475_s15, %s2965_s15   ;;  %s2390_s14 = sphi %s2473_s14, %s2964_s14   ;;  %s2386_s13 = sphi %s2471_s13, %s2963_s13  }
   0x7   : > { %s1826_s18 = sadd.s32 4294967294, %s2398_s16   ;;  %p47_p0 = scmp.ne.s32.totalorder %s2390_s14, %s2386_s13 }
   0x8   : > { %p2937_p1 = scmp.eq.s32.totalorder %s2492_s17, 0  ;;  %p271_p3 = scmp.eq.s32.totalorder %s1826_s18, 1 }
   0x9   : > { %p1827_p5 = scmp.ge.s32.totalorder %s2398_s16, 1  ;;  %p278_p7 = scmp.lt.s32.totalorder %s2398_s16, 3 }
   0xa   : > { %p2501_p4 = por %p2937_p1, %p47_p0  ;;  %p2506_p6 = por %p271_p3, %p47_p0 }
   0xb   : > { %p2511_p8 = pnand %p1827_p5, %p278_p7  ;;  %s2400_s22 = smov [#allocation5]  }
   0xc   : > { %s2945_s19 = scalar_select %p2501_p4, 1, 0 }
   0xd   : > { %s2946_s20 = scalar_select %p2506_p6, 1, 0 }
   0xe   : > { %s302_s23 = sshll.u32 %s2400_s22, 4  ;;  %p2119_p9 = pneg %p2511_p8  ;;  %s2515_s23 = int_to_ptr.vmem [resolvable:$true] %s302_s23 }
   0xf   : > { %2947 = sst [smem:[#allocation13_spill]] %s2946_s20  ;;  %s2401_s25 = smov [#allocation7]  }
  0x10   : > { %p2522_p11 = pnand %p2119_p9, %p2937_p1  ;;  %s318_s26 = sshll.u32 %s2401_s25, 4  ;;  %s2526_s26 = int_to_ptr.vmem [resolvable:$true] %s318_s26 }
  0x11   : > { %s2242_s29 = scalar_lea.hbm %s2932_s6, 256 }
  0x12   : > { %p2243_p12 = scmp.ne.s32.totalorder %s2932_s6, %s2242_s29  ;;  %p2244_p13 = pneg %p2522_p11 }
  0x13   : > { %p2249_p5 = scmp.lt.u32.totalorder %s2242_s29, %s2932_s6 }
  0x14   : > { %p2245_p0 = pnand %p2244_p13, %p2243_p12 }
  0x16   : > { %p2246_p3 = pneg %p2245_p0 }
  0x18   : > { %p2251_p7 = pnand %p2249_p5, %p2246_p3 }
  0x1a   : > { %2254 = shalt.err (!%p2251_p7)
}
  0x1b   : > { %s2255_s22 = scalar_lea.vmem %s2515_s23, 256  ;;  %p2263_p2 = scmp.lt.s32.totalorder %s2515_s23, %s2515_s23 }
  0x1c   : > { %p2256_p9 = scmp.ne.s32.totalorder %s2515_s23, %s2255_s22  ;;  %p2264_p12 = scmp.lt.s32.totalorder %s2255_s22, %s2255_s22 }
  0x1e   : > { %p2258_p10 = pnand %p2256_p9, %p2244_p13  ;;  %p2265_p0 = por %p2264_p12, %p2263_p2 }
  0x20   : > { %p2259_p1 = pneg %p2258_p10 }
  0x22   : > { %p2266_p6 = pnand %p2265_p0, %p2259_p1 }
  0x24   : > { %2269 = shalt.err (!%p2266_p6)
}
  0x25   : > { %s2402_s25 = smov 128   ;;  %s2403_s27 = smov 8  }
  0x26   : > { %2122 = dma.hbm_to_vmem [thread:$0]  (!%p2522_p11), %s2932_s6, 256, %s2515_s23, [#allocation6], %s2402_s25, %s2402_s25, %s2403_s27  }
  0x27   : > { %s2270_s12 = scalar_lea.hbm %s2934_s8, 256 }
  0x28   : > { %p2271_p2 = scmp.ne.s32.totalorder %s2934_s8, %s2270_s12  ;;  %p2277_p10 = scmp.lt.u32.totalorder %s2270_s12, %s2934_s8 }
  0x2a   : > { %p2273_p1 = pnand %p2271_p2, %p2244_p13 }
  0x2c   : > { %p2274_p6 = pneg %p2273_p1 }
  0x2e   : > { %p2279_p3 = pnand %p2277_p10, %p2274_p6 }
  0x30   : > { %2282 = shalt.err (!%p2279_p3)
}
  0x31   : > { %s2283_s23 = scalar_lea.vmem %s2526_s26, 256  ;;  %p2291_p12 = scmp.lt.s32.totalorder %s2526_s26, %s2526_s26 }
  0x32   : > { %p2284_p5 = scmp.ne.s32.totalorder %s2526_s26, %s2283_s23  ;;  %p2292_p0 = scmp.lt.s32.totalorder %s2283_s23, %s2283_s23 }
  0x34   : > { %p2286_p7 = pnand %p2284_p5, %p2244_p13  ;;  %p2293_p2 = por %p2292_p0, %p2291_p12 }
  0x36   : > { %p2287_p9 = pneg %p2286_p7 }
  0x38   : > { %p2294_p1 = pnand %p2293_p2, %p2287_p9 }
  0x3a   : > { %2297 = shalt.err (!%p2294_p1)
}
  0x3b   : > { %s2404_s13 = smov 64   ;;  %s2405_s20 = smov 4  }
  0x3c   : > { %2125 = dma.hbm_to_vmem [thread:$0]  (!%p2522_p11), %s2934_s8, 256, %s2526_s26, [#allocation6], %s2404_s13, %s2404_s13, %s2405_s20  }
  0x3d   : > { %s2581_s28 = sadd.s32 1, %s2398_s16   ;;  %s34_s30 = sadd.s32 1, %s2394_s15 }
  0x3e   : > { %s31_s29 = ssub.s32 %s2398_s16, %s2581_s28  ;;  %p41_p6 = scmp.ne.s32.totalorder %s2394_s15, %s2390_s14 }
  0x3f   : > { %p32_p13 = scmp.eq.s32.totalorder %s31_s29, 0  ;;  %p42_p10 = scmp.eq.s32.totalorder %s2398_s16, 0 }
  0x40   : > { %p2950_p5 = scmp.eq.s32.totalorder %s2492_s17, 1  ;;  %p2136_p9 = scmp.lt.s32.totalorder %s2398_s16, 2 }
  0x41   : > { %s2590_s11 = scalar_select %p32_p13, %s2394_s15, %s34_s30  }
  0x42   : > { %p43_p3 = por %p42_p10, %p41_p6  ;;  %p2594_p7 = por %p2950_p5, %p41_p6 }
  0x43   : > { %s335_s24 = sand.u32 1, %s2394_s15   ;;  %s1832_s26 = sshll.u32 %s2398_s16, 7 }
  0x44   : > { %s2951_s12 = scalar_select %p2594_p7, 1, 0 }
  0x45   : > { %s1831_s18 = sshll.u32 %s335_s24, 3  ;;  %s2604_s13 = scalar_lea.hbm %s2926_s0, %s1832_s26 }
  0x46   : > { %s339_s20 = scalar_lea.vmem [#allocation2], %s1831_s18  ;;  %p2608_p11 = pnand %p2136_p9, %p43_p3 }
  0x47   : > { %s346_s25 = sshll.u32 %s339_s20, 4  ;;  %s336_s29 = scalar_lea.sflag [#allocation3], %s335_s24  ;;  %s2606_s25 = int_to_ptr.vmem [resolvable:$true] %s346_s25 }
  0x48   : > { %s2298_s30 = scalar_lea.hbm %s2604_s13, 128  ;;  %p2300_p0 = pneg %p2608_p11 }
  0x49   : > { %p2299_p12 = scmp.ne.s32.totalorder %s2604_s13, %s2298_s30  ;;  %s2303_s22 = scalar_lea.hbm %s2926_s0, 256 }
  0x4a   : > { %p2304_p13 = scmp.lt.u32.totalorder %s2604_s13, %s2926_s0  ;;  %p2305_p6 = scmp.lt.u32.totalorder %s2303_s22, %s2298_s30 }
  0x4b   : > { %p2301_p2 = pnand %p2300_p0, %p2299_p12  ;;  %p2307_p3 = scmp.lt.u32.totalorder %s2298_s30, %s2604_s13 }
  0x4c   : > { %p2306_p10 = por %p2305_p6, %p2304_p13 }
  0x4d   : > { %p2302_p1 = pneg %p2301_p2 }
  0x4e   : > { %p2308_p5 = por %p2307_p3, %p2306_p10 }
  0x50   : > { %p2309_p9 = pnand %p2308_p5, %p2302_p1 }
  0x52   : > { %2312 = shalt.err (!%p2309_p9)
}
  0x53   : > { %s2313_s24 = scalar_lea.vmem %s2606_s25, 128  ;;  %s2406_s26 = smov [#allocation2]  }
  0x54   : > { %p2314_p12 = scmp.ne.s32.totalorder %s2606_s25, %s2313_s24  ;;  %s2318_s18 = sshll.u32 %s2406_s26, 4  ;;  %s2319_s18 = int_to_ptr.vmem [resolvable:$false] %s2318_s18 }
  0x55   : > { %s2320_s23 = scalar_lea.vmem %s2319_s18, 256  ;;  %p2321_p4 = scmp.lt.s32.totalorder %s2606_s25, %s2319_s18 }
  0x56   : > { %p2316_p2 = pnand %p2314_p12, %p2300_p0  ;;  %p2322_p13 = scmp.lt.s32.totalorder %s2320_s23, %s2313_s24 }
  0x58   : > { %p2317_p7 = pneg %p2316_p2  ;;  %p2323_p6 = por %p2322_p13, %p2321_p4 }
  0x5a   : > { %p2324_p10 = pnand %p2323_p6, %p2317_p7 }
  0x5c   : > { %2327 = shalt.err (!%p2324_p10)
}
  0x5d   : > { %2129 = dma.hbm_to_vmem [thread:$0]  (!%p2608_p11), %s2604_s13, 128, %s2606_s25, %s336_s29  }
  0x5e   : > { %361 = sbr.rel (%p2511_p8) target bundleno = 5901 (0x170d), region = 60  ;;  %s2640_s30 = sand.u32 (!%p2511_p8), 1, %s2390_s14  }
  0x5f   : > { %s1834_s22 = sshll.u32 (!%p2511_p8), %s2640_s30, 3  ;;  %s364_s20 = scalar_lea.sflag (!%p2511_p8), [#allocation3], %s2640_s30 }
  0x60   : > { %s367_s24 = scalar_lea.vmem (!%p2511_p8), [#allocation2], %s1834_s22  ;;  %p2953_p4 = scmp.ne.s32.totalorder (!%p2511_p8), %s2945_s19, 0 }
  0x65   : > { %2373 = dma.done.wait (%p2953_p4), %s364_s20, 128  }
  0x66   : > { %2375 = vsyncadd (%p2953_p4), %s364_s20, 4294967168  ;;  %p2954_p7 = scmp.eq.s32.totalorder %s2492_s17, 0 }
  0x68   : > { %2377 = dma.done.wait (%p2954_p7), [#allocation6], 512   ;;  %p2955_p11 = pmov %p2954_p7 }
  0x69   : > { %vm423_vm0 = vcmask 261120   ;;  %v422_v0 = vld [vmem:[%s367_s24] sm:$0xff]  ;;  %v2407_v8 = vmov 0.0   ;;  %vm2408_vm1 = vmmov 0   ;;  %v1839_v20 = vld [vmem:[#allocation5] ss:$0 sm:$0xff] }
  0x6a   : > { %2379 = vsyncadd (%p2955_p11), [#allocation6], 4294966784  ;;  %v424_v1 = vsel %vm423_vm0, %v422_v0, 0.0  ;;  %v2186_v7 = vld [vmem:[%s2928_s2] sm:$0xff]   ;;  %1971 = vmatprep.subr.bf16.mxu0 %v2407_v8  ;;  %1979 = vmatprep.subr.bf16.mxu1 %v2407_v8  ;;  %v2187_v9 = vld [vmem:[%s2928_s2 + $0x8] sm:$0xff]   ;;  %s2409_s23 = smov 112  }
  0x6b   : > { %425 = vadd.xlane.f32.xlu0 %v424_v1  ;;  %1972 = vmatpush3.bf16.msra.mxu0 %v2186_v7  ;;  %v1837_v14 = vld [vmem:[%s2933_s7] ss:$0 sm:$0xff]  ;;  %v1838_v16 = vld [vmem:[%s2933_s7 + $0x1] ss:$0 sm:$0xff]  ;;  %s2410_s22 = smov 96   ;;  %s2411_s20 = smov 80  }
  0x6c   : > { %1975 = vmatprep.mubr.msk.bf16.mxu0 %vm2408_vm1, %v2407_v8  ;;  %1973 = vmatprep.subr.bf16.mxu0 %v2407_v8  ;;  %vm525_vm2 = vcmask 130048   ;;  %p414_p8 = scmp.lt.s32.totalorder %s2492_s17, 1  ;;  %vm580_vm3 = vcmask 64512   ;;  %s2943_s25 = smov 48   ;;  %vm598_vm4 = vcmask 1043456   ;;  %vm957_vm5 = vcmask 523264  }
  0x6d   : > { %1981 = vmatprep.mubr.msk.bf16.mxu1 %vm2408_vm1, %v2407_v8  ;;  %s2413_s27 = smov 64   ;;  %s2942_s19 = smov 16   ;;  %vm1717_vm6 = vcmask 8192  }
  0x6e   : > { %s415_s24 = scalar_select %p414_p8, %s2492_s17, 1 }
  0x6f   : > { %1974 = vmatpush3.bf16.msra.mxu0 %v2187_v9  ;;  %p2958_p1 = scmp.ne.s32.totalorder %s2951_s12, 0 }
  0x70   : > { %1985 = vmatprep.subr.bf16.mxu0 %v2407_v8  ;;  %s416_s13 = scalar_lea.vmem %s2927_s1, %s415_s24 }
  0x71   : > { %v2699_v33 = vld [vmem:[%s416_s13] ss:$0 sm:$0xff]  ;;  %s2957_s13 = smov 16  }
  0xf8   : > { %v426_v2 = vpop.xlane.xlu0 %425 }
  0xf9   : > { %v428_v3 = vmul.f32 0.03125, %v426_v2 }
  0xfb   : > { %v429_v4 = vsub.f32 %v422_v0, %v428_v3 }
  0xfd   : > { %v430_v5 = vmul.f32 %v429_v4, %v429_v4 }
  0xff   : > { %v431_v6 = vsel %vm423_vm0, %v430_v5, 0.0  ;;  %v2188_v5 = vld [vmem:[%s2929_s3] sm:$0xff]  }
 0x100   : > { %432 = vadd.xlane.f32.xlu0 %v431_v6  ;;  %v2189_v6 = vld [vmem:[%s2929_s3 + $0x8] sm:$0xff]  }
 0x18d   : > { %v433_v10 = vpop.xlane.xlu0 %432 }
 0x18e   : > { %v434_v11 = vmul.f32 0.03125, %v433_v10 }
 0x190   : > { %v435_v12 = vadd.f32 1e-12, %v434_v11 }
 0x192   : > { %2210 = vrsqrt.f32 %v435_v12 }
 0x19c   : > { %v2211_v13 = vpop.eup %2210 }
 0x19d   : > { %v437_v15 = vmul.f32 %v2211_v13, %v429_v4 }
 0x19f   : > { %v442_v17 = vmul.f32 %v1837_v14, %v437_v15 }
 0x1a1   : > { %v2674_v18 = vadd.f32 %v1838_v16, %v442_v17 }
 0x1a3   : > { %v456_v19 = vpack.c.bf16 %v2674_v18, %v2674_v18 }
 0x1a5   : > { %1976 = vmatmul.mubr.msk.bf16.vlgmr.msra.gmra.mrb[0].mxu0 %vm423_vm0, %v456_v19 }
 0x1a6   : > { %1987 = vmatprep.mubr.msk.bf16.mxu0 %vm2408_vm1, %v2407_v8 }
 0x278   : > { %v514_v21 = vpop.f32.mrb[0].mxu0 }
 0x279   : > { %v515_v22 = vadd.f32 %v1839_v20, %v514_v21  ;;  %v1977_v23 = vpop.f32.mrb[1].mxu0  ;;  %v1848_v20 = vld [vmem:[#allocation5 + $0x1] ss:$0 sm:$0xff] }
 0x27a   : > { %v517_v24 = vpop.f32.mrb[2].mxu0 }
 0x27b   : > { %v520_v25 = vpack.c.bf16 %v515_v22, %v515_v22  ;;  %v1978_v26 = vpop.f32.mrb[3].mxu0 }
 0x27d   : > { %642 = vrot.lane.b32.xlu0 %v520_v25, %s2409_s23  ;;  %523 = vrot.lane.b32.xlu1 %v520_v25, %s2410_s22 }
 0x281   : > { %644 = vrot.lane.b32.xlu1 %v520_v25, %s2411_s20 }
 0x2ef   : > { %v524_v27 = vpop.permute.xlu1 %523  ;;  %v643_v31 = vpop.permute.xlu0 %642 }
 0x2f0   : > { %v530_v28 = vsel %vm525_vm2, %v524_v27, 0 }
 0x2f1   : > { %1980 = vmatpush3.bf16.xpose.msra.mxu1 %v530_v28 }
 0x2f2   : > { %1991 = vmatprep.subr.bf16.mxu1 %v2407_v8 }
 0x2f3   : > { %v645_v29 = vpop.permute.xlu1 %644 }
 0x2f4   : > { %v650_v30 = vsel %vm525_vm2, %v645_v29, 0 }
 0x2f8   : > { %1982 = vmatmul.mubr.msk.bf16.vlgmr.msra.gmra.mrb[0].mxu1 %vm525_vm2, %v520_v25 }
 0x2f9   : > { %1992 = vmatpush3.bf16.xpose.msra.mxu1 %v650_v30  ;;  %1993 = vmatprep.mubr.msk.bf16.mxu1 %vm2408_vm1, %v2407_v8 }
 0x2fa   : > { %2003 = vmatprep.subr.bf16.mxu1 %v2407_v8 }
 0x300   : > { %1994 = vmatmul.mubr.msk.bf16.vlgmr.msra.gmra.mrb[4].mxu1 %vm525_vm2, %v643_v31 }
 0x301   : > { %2007 = vmatprep.mubr.msk.bf16.mxu1 %vm2408_vm1, %v2407_v8  ;;  %2004 = vmatpush3.bf16.msra.mxu1 %v2188_v5 }
 0x302   : > { %2005 = vmatprep.subr.bf16.mxu1 %v2407_v8 }
 0x305   : > { %2006 = vmatpush3.bf16.msra.mxu1 %v2189_v6 }
 0x306   : > { %2019 = vmatprep.subr.bf16.mxu1 %v2407_v8 }
 0x3cb   : > { %v566_v32 = vpop.f32.mrb[0].mxu1 }
 0x3cc   : > { %v572_v34 = vmul.f32 0.25, %v566_v32  ;;  %v1983_v35 = vpop.f32.mrb[1].mxu1 }
 0x3cd   : > { %v569_v36 = vpop.f32.mrb[2].mxu1 }
 0x3ce   : > { %v1984_v37 = vpop.f32.mrb[3].mxu1  ;;  %v579_v38 = vadd.f32 %v2699_v33, %v572_v34  ;;  %v2190_v34 = vld [vmem:[%s2930_s4] sm:$0xff]  }
 0x3d0   : > { %v581_v39 = vsel %vm580_vm3, %v579_v38, -inf }
 0x3d1   : > { %582 = vmax.xlane.f32.xlu1 %v581_v39  ;;  %v1852_v39 = vld [vmem:[#allocation5 + $0x2] ss:$0 sm:$0xff] }
 0x3d3   : > { %v686_v40 = vpop.f32.mrb[4].mxu1 }
 0x3d4   : > { %v692_v41 = vmul.f32 0.25, %v686_v40  ;;  %v1995_v42 = vpop.f32.mrb[5].mxu1 }
 0x3d5   : > { %v689_v43 = vpop.f32.mrb[6].mxu1 }
 0x3d6   : > { %v1996_v44 = vpop.f32.mrb[7].mxu1  ;;  %v693_v45 = vadd.f32 %v2699_v33, %v692_v41  ;;  %v1853_v41 = vld [vmem:[#allocation5 + $0x3] ss:$0 sm:$0xff] }
 0x3d8   : > { %v694_v46 = vsel %vm580_vm3, %v693_v45, -inf }
 0x3d9   : > { %695 = vmax.xlane.f32.xlu0 %v694_v46  ;;  %v2193_v46 = vld [vmem:[%s2931_s5 + $0x8] sm:$0xff]  }
 0x3ef   : > { %706 = vrot.lane.b32.xlu0 %v520_v25, %s2943_s25 }
 0x45e   : > { %v583_v47 = vpop.xlane.xlu1 %582 }
 0x45f   : > { %v584_v48 = vsub.f32 %v579_v38, %v583_v47  ;;  %v2194_v47 = vld [vmem:[%s2931_s5 + $0x10] sm:$0xff]  }
 0x461   : > { %v585_v49 = vmul.f32 1.442695, %v584_v48  ;;  %v2195_v48 = vld [vmem:[%s2931_s5 + $0x18] sm:$0xff]  }
 0x463   : > { %2212 = vpow2.f32 %v585_v49  ;;  %v1854_v49 = vld [vmem:[#allocation5 + $0x4] ss:$0 sm:$0xff] }
 0x466   : > { %v696_v50 = vpop.xlane.xlu0 %695 }
 0x467   : > { %v697_v51 = vsub.f32 %v693_v45, %v696_v50  ;;  %v2192_v45 = vld [vmem:[%s2931_s5] sm:$0xff]  }
 0x469   : > { %v698_v52 = vmul.f32 1.442695, %v697_v51 }
 0x46a   : > { %v707_v63 = vpop.permute.xlu0 %706 }
 0x46b   : > { %2214 = vpow2.f32 %v698_v52  ;;  %v712_v1 = vsel %vm598_vm4, %v707_v63, 0 }
 0x46d   : > { %v2213_v53 = vpop.eup %2212 }
 0x46e   : > { %v587_v54 = vsel %vm580_vm3, %v2213_v53, 0.0 }
 0x46f   : > { %588 = vadd.xlane.f32.xlu1 %v587_v54 }
 0x475   : > { %v2215_v55 = vpop.eup %2214 }
 0x476   : > { %v700_v56 = vsel %vm580_vm3, %v2215_v55, 0.0 }
 0x477   : > { %701 = vadd.xlane.f32.xlu1 %v700_v56 }
 0x488   : > { %593 = vrot.lane.b32.xlu1 %v520_v25, %s2413_s27 }
 0x4fc   : > { %v589_v57 = vpop.xlane.xlu1 %588 }
 0x4fd   : > { %2216 = vrcp.f32 %v589_v57 }
 0x504   : > { %v702_v58 = vpop.xlane.xlu1 %701 }
 0x505   : > { %2218 = vrcp.f32 %v702_v58 }
 0x507   : > { %v2217_v59 = vpop.eup %2216 }
 0x508   : > { %v591_v60 = vmul.f32 %v2217_v59, %v2213_v53  ;;  %v594_v61 = vpop.permute.xlu1 %593 }
 0x509   : > { %v600_v62 = vsel %vm598_vm4, %v594_v61, 0 }
 0x50a   : > { %1986 = vmatpush3.bf16.msra.mxu0 %v600_v62  ;;  %v592_v0 = vpack.c.bf16 %v591_v60, %v591_v60 }
 0x50b   : > { %1997 = vmatprep.subr.bf16.mxu0 %v2407_v8 }
 0x50d   : > { %1988 = vmatmul.mubr.msk.bf16.vlgmr.msra.gmra.mrb[4].mxu0 %vm580_vm3, %v592_v0 }
 0x50e   : > { %1998 = vmatpush3.bf16.msra.mxu0 %v712_v1  ;;  %1999 = vmatprep.mubr.msk.bf16.mxu0 %vm2408_vm1, %v2407_v8  ;;  %v1858_v1 = vld [vmem:[#allocation5 + $0x5] ss:$0 sm:$0xff] }
 0x50f   : > { %v2219_v2 = vpop.eup %2218  ;;  %2011 = vmatprep.subr.bf16.mxu0 %v2407_v8 }
 0x510   : > { %v704_v3 = vmul.f32 %v2219_v2, %v2215_v55 }
 0x512   : > { %v705_v4 = vpack.c.bf16 %v704_v3, %v704_v3 }
 0x515   : > { %2000 = vmatmul.mubr.msk.bf16.vlgmr.msra.gmra.mrb[8].mxu0 %vm580_vm3, %v705_v4 }
 0x516   : > { %2015 = vmatprep.mubr.msk.bf16.mxu0 %vm2408_vm1, %v2407_v8  ;;  %2012 = vmatpush3.bf16.msra.mxu0 %v2190_v34 }
 0x517   : > { %2013 = vmatprep.subr.bf16.mxu0 %v2407_v8 }
 0x5e0   : > { %v636_v7 = vpop.f32.mrb[4].mxu0 }
 0x5e1   : > { %v1989_v9 = vpop.f32.mrb[5].mxu0 }
 0x5e2   : > { %v639_v10 = vpop.f32.mrb[6].mxu0 }
 0x5e3   : > { %v1990_v11 = vpop.f32.mrb[7].mxu0 }
 0x5e8   : > { %v748_v12 = vpop.f32.mrb[8].mxu0 }
 0x5e9   : > { %755 = vrot.lane.b32.xlu1 %v748_v12, %s2942_s19  ;;  %v2001_v13 = vpop.f32.mrb[9].mxu0  ;;  %s2415_s19 = smov [#allocation8]  }
 0x5ea   : > { %v751_v14 = vpop.f32.mrb[10].mxu0  ;;  %s2332_s18 = sshll.u32 %s2415_s19, 4  ;;  %s2333_s18 = int_to_ptr.vmem [resolvable:$false] %s2332_s18 }
 0x5eb   : > { %v2002_v15 = vpop.f32.mrb[11].mxu0  ;;  %s2334_s24 = scalar_lea.vmem %s2333_s18, 32 }
 0x5ec   : > { %v2196_v15 = vld [vmem:[%s2928_s2 + $0x10] sm:$0xff]  }
 0x65b   : > { %v756_v16 = vpop.permute.xlu1 %755 }
 0x65c   : > { %v758_v17 = vsel %vm525_vm2, %v636_v7, %v756_v16  ;;  %v2197_v16 = vld [vmem:[%s2928_s2 + $0x18] sm:$0xff]  }
 0x65d   : > { %v759_v19 = vpack.c.bf16 %v758_v17, %v758_v17 }
 0x65f   : > { %2008 = vmatmul.mubr.msk.bf16.vlgmr.msra.gmra.mrb[8].mxu1 %vm423_vm0, %v759_v19 }
 0x660   : > { %2027 = vmatprep.mubr.msk.bf16.mxu1 %vm2408_vm1, %v2407_v8  ;;  %2020 = vmatpush3.bf16.msra.mxu1 %v2192_v45 }
 0x661   : > { %2021 = vmatprep.subr.bf16.mxu1 %v2407_v8 }
 0x664   : > { %2022 = vmatpush3.bf16.msra.mxu1 %v2193_v46 }
 0x665   : > { %2023 = vmatprep.subr.bf16.mxu1 %v2407_v8 }
 0x668   : > { %2024 = vmatpush3.bf16.msra.mxu1 %v2194_v47 }
 0x669   : > { %2025 = vmatprep.subr.bf16.mxu1 %v2407_v8 }
 0x66c   : > { %2026 = vmatpush3.bf16.msra.mxu1 %v2195_v48 }
 0x66d   : > { %2045 = vmatprep.subr.bf16.mxu1 %v2407_v8 }
 0x732   : > { %v817_v21 = vpop.f32.mrb[8].mxu1 }
 0x733   : > { %v818_v22 = vadd.f32 %v1848_v20, %v817_v21  ;;  %v2009_v23 = vpop.f32.mrb[9].mxu1 }
 0x734   : > { %v820_v24 = vpop.f32.mrb[10].mxu1 }
 0x735   : > { %v2010_v25 = vpop.f32.mrb[11].mxu1  ;;  %v823_v26 = vadd.f32 %v818_v22, %v2674_v18  ;;  %v2191_v18 = vld [vmem:[%s2930_s4 + $0x8] sm:$0xff]   ;;  %v1864_v22 = vld [vmem:[#allocation5 + $0x6] ss:$0 sm:$0xff]  ;;  %v1865_v24 = vld [vmem:[#allocation5 + $0x7] ss:$0 sm:$0xff] }
 0x736   : > { %2014 = vmatpush3.bf16.msra.mxu0 %v2191_v18 }
 0x737   : > { %v824_v27 = vsel %vm423_vm0, %v823_v26, 0.0  ;;  %2031 = vmatprep.subr.bf16.mxu0 %v2407_v8 }
 0x738   : > { %825 = vadd.xlane.f32.xlu1 %v824_v27 }
 0x7c5   : > { %v826_v28 = vpop.xlane.xlu1 %825 }
 0x7c6   : > { %v827_v29 = vmul.f32 0.03125, %v826_v28  ;;  %v1870_v28 = vld [vmem:[#allocation5 + $0x8] ss:$0 sm:$0xff] }
 0x7c8   : > { %v828_v30 = vsub.f32 %v823_v26, %v827_v29 }
 0x7ca   : > { %v829_v31 = vmul.f32 %v828_v30, %v828_v30 }
 0x7cc   : > { %v830_v32 = vsel %vm423_vm0, %v829_v31, 0.0 }
 0x7cd   : > { %831 = vadd.xlane.f32.xlu0 %v830_v32 }
 0x85a   : > { %v832_v35 = vpop.xlane.xlu0 %831 }
 0x85b   : > { %v833_v36 = vmul.f32 0.03125, %v832_v35 }
 0x85d   : > { %v834_v37 = vadd.f32 1e-12, %v833_v36 }
 0x85f   : > { %2220 = vrsqrt.f32 %v834_v37 }
 0x869   : > { %v2221_v38 = vpop.eup %2220 }
 0x86a   : > { %v836_v40 = vmul.f32 %v2221_v38, %v828_v30 }
 0x86c   : > { %v841_v42 = vmul.f32 %v1852_v39, %v836_v40 }
 0x86e   : > { %v846_v43 = vadd.f32 %v1853_v41, %v841_v42 }
 0x870   : > { %v847_v44 = vpack.c.bf16 %v846_v43, %v846_v43 }
 0x872   : > { %2016 = vmatmul.mubr.msk.bf16.vlgmr.msra.gmra.mrb[12].mxu0 %vm423_vm0, %v847_v44 }
 0x873   : > { %2035 = vmatprep.mubr.msk.bf16.mxu0 %vm2408_vm1, %v2407_v8  ;;  %2032 = vmatpush3.bf16.msra.mxu0 %v2196_v15 }
 0x874   : > { %2033 = vmatprep.subr.bf16.mxu0 %v2407_v8 }
 0x877   : > { %2034 = vmatpush3.bf16.msra.mxu0 %v2197_v16 }
 0x878   : > { %2039 = vmatprep.subr.bf16.mxu0 %v2407_v8 }
 0x945   : > { %v905_v50 = vpop.f32.mrb[12].mxu0 }
 0x946   : > { %v906_v51 = vadd.f32 %v1854_v49, %v905_v50  ;;  %v2017_v52 = vpop.f32.mrb[13].mxu0 }
 0x947   : > { %v908_v53 = vpop.f32.mrb[14].mxu0 }
 0x948   : > { %v912_v54 = vmul.f32 0.044715, %v906_v51  ;;  %v2018_v55 = vpop.f32.mrb[15].mxu0  ;;  %v911_v61 = vmul.f32 0.5, %v906_v51 }
 0x94a   : > { %v913_v56 = vmul.f32 %v912_v54, %v906_v51 }
 0x94c   : > { %v914_v57 = vmul.f32 %v913_v56, %v906_v51 }
 0x94e   : > { %v915_v58 = vadd.f32 %v914_v57, %v906_v51 }
 0x950   : > { %v916_v59 = vmul.f32 0.7978846, %v915_v58 }
 0x952   : > { %2222 = vtanh.f32 %v916_v59 }
 0x95c   : > { %v2223_v60 = vpop.eup %2222 }
 0x95d   : > { %v918_v62 = vadd.f32 1.0, %v2223_v60 }
 0x95f   : > { %v919_v63 = vmul.f32 %v918_v62, %v911_v61 }
 0x961   : > { %v920_v0 = vpack.c.bf16 %v919_v63, %v919_v63 }
 0x963   : > { %2028 = vmatmul.mubr.msk.bf16.vlgmr.msra.gmra.mrb[12].mxu1 %vm957_vm5, %v920_v0 }
 0x964   : > { %2047 = vmatprep.mubr.msk.bf16.mxu1 %vm2408_vm1, %v2407_v8 }
 0xa36   : > { %v995_v2 = vpop.f32.mrb[12].mxu1 }
 0xa37   : > { %v996_v3 = vadd.f32 %v1858_v1, %v995_v2  ;;  %v2029_v4 = vpop.f32.mrb[13].mxu1 }
 0xa38   : > { %v998_v5 = vpop.f32.mrb[14].mxu1 }
 0xa39   : > { %v2030_v6 = vpop.f32.mrb[15].mxu1  ;;  %v1001_v7 = vadd.f32 %v996_v3, %v846_v43 }
 0xa3b   : > { %v1002_v9 = vsel %vm423_vm0, %v1001_v7, 0.0 }
 0xa3c   : > { %1003 = vadd.xlane.f32.xlu1 %v1002_v9 }
 0xac9   : > { %v1004_v10 = vpop.xlane.xlu1 %1003 }
 0xaca   : > { %v1005_v11 = vmul.f32 0.03125, %v1004_v10 }
 0xacc   : > { %v1006_v12 = vsub.f32 %v1001_v7, %v1005_v11 }
 0xace   : > { %v1007_v13 = vmul.f32 %v1006_v12, %v1006_v12 }
 0xad0   : > { %v1008_v14 = vsel %vm423_vm0, %v1007_v13, 0.0  ;;  %v2199_v13 = vld [vmem:[%s2929_s3 + $0x18] sm:$0xff]  }
 0xad1   : > { %1009 = vadd.xlane.f32.xlu1 %v1008_v14 }
 0xb5e   : > { %v1010_v17 = vpop.xlane.xlu1 %1009 }
 0xb5f   : > { %v1011_v19 = vmul.f32 0.03125, %v1010_v17 }
 0xb61   : > { %v1012_v20 = vadd.f32 1e-12, %v1011_v19 }
 0xb63   : > { %2224 = vrsqrt.f32 %v1012_v20 }
 0xb6d   : > { %v2225_v21 = vpop.eup %2224 }
 0xb6e   : > { %v1014_v23 = vmul.f32 %v2225_v21, %v1006_v12  ;;  %v2198_v12 = vld [vmem:[%s2929_s3 + $0x10] sm:$0xff]  }
 0xb70   : > { %v1019_v25 = vmul.f32 %v1864_v22, %v1014_v23 }
 0xb72   : > { %v2775_v26 = vadd.f32 %v1865_v24, %v1019_v25 }
 0xb74   : > { %v1034_v27 = vpack.c.bf16 %v2775_v26, %v2775_v26 }
 0xb76   : > { %2036 = vmatmul.mubr.msk.bf16.vlgmr.msra.gmra.mrb[16].mxu0 %vm423_vm0, %v1034_v27  ;;  %v1882_v27 = vld [vmem:[#allocation5 + $0x9] ss:$0 sm:$0xff] }
 0xb77   : > { %2041 = vmatprep.mubr.msk.bf16.mxu0 %vm2408_vm1, %v2407_v8 }
 0xc49   : > { %v1093_v29 = vpop.f32.mrb[16].mxu0 }
 0xc4a   : > { %v1094_v30 = vadd.f32 %v1870_v28, %v1093_v29  ;;  %v2037_v31 = vpop.f32.mrb[17].mxu0 }
 0xc4b   : > { %v1096_v32 = vpop.f32.mrb[18].mxu0 }
 0xc4c   : > { %v1099_v34 = vpack.c.bf16 %v1094_v30, %v1094_v30  ;;  %v2038_v18 = vpop.f32.mrb[19].mxu0 }
 0xc4e   : > { %1213 = vrot.lane.b32.xlu1 %v1099_v34, %s2411_s20  ;;  %1101 = vrot.lane.b32.xlu0 %v1099_v34, %s2410_s22  ;;  %s1918_s20 = sshll.u32 %s2492_s17, 4  ;;  %s1720_s17 = scalar_lea.sflag [#allocation4], %s2640_s30 }
 0xc4f   : > { %s2882_s26 = scalar_lea.hbm %s2936_s10, %s1918_s20 }
 0xc52   : > { %1211 = vrot.lane.b32.xlu1 %v1099_v34, %s2409_s23  ;;  %s2956_s23 = smov 48  }
 0xcc0   : > { %v1102_v35 = vpop.permute.xlu0 %1101  ;;  %v1214_v37 = vpop.permute.xlu1 %1213 }
 0xcc1   : > { %v1107_v36 = vsel %vm525_vm2, %v1102_v35, 0  ;;  %v1219_v38 = vsel %vm525_vm2, %v1214_v37, 0 }
 0xcc2   : > { %2040 = vmatpush3.bf16.xpose.msra.mxu0 %v1107_v36 }
 0xcc3   : > { %2051 = vmatprep.subr.bf16.mxu0 %v2407_v8 }
 0xcc4   : > { %v1212_v39 = vpop.permute.xlu1 %1211 }
 0xcc9   : > { %2042 = vmatmul.mubr.msk.bf16.vlgmr.msra.gmra.mrb[20].mxu0 %vm525_vm2, %v1099_v34 }
 0xcca   : > { %2052 = vmatpush3.bf16.xpose.msra.mxu0 %v1219_v38  ;;  %2053 = vmatprep.mubr.msk.bf16.mxu0 %vm2408_vm1, %v2407_v8 }
 0xccb   : > { %2063 = vmatprep.subr.bf16.mxu0 %v2407_v8 }
 0xcd1   : > { %2054 = vmatmul.mubr.msk.bf16.vlgmr.msra.gmra.mrb[24].mxu0 %vm525_vm2, %v1212_v39 }
 0xcd2   : > { %2067 = vmatprep.mubr.msk.bf16.mxu0 %vm2408_vm1, %v2407_v8  ;;  %2064 = vmatpush3.bf16.msra.mxu0 %v2198_v12 }
 0xcd3   : > { %2065 = vmatprep.subr.bf16.mxu0 %v2407_v8 }
 0xcd6   : > { %2066 = vmatpush3.bf16.msra.mxu0 %v2199_v13 }
 0xcd7   : > { %2079 = vmatprep.subr.bf16.mxu0 %v2407_v8 }
 0xd9c   : > { %v1143_v40 = vpop.f32.mrb[20].mxu0 }
 0xd9d   : > { %v1149_v41 = vmul.f32 0.25, %v1143_v40  ;;  %v2043_v42 = vpop.f32.mrb[21].mxu0  ;;  %v2200_v40 = vld [vmem:[%s2930_s4 + $0x10] sm:$0xff]  }
 0xd9e   : > { %v1146_v43 = vpop.f32.mrb[22].mxu0 }
 0xd9f   : > { %v2044_v44 = vpop.f32.mrb[23].mxu0  ;;  %v1150_v45 = vadd.f32 %v2699_v33, %v1149_v41  ;;  %v2201_v41 = vld [vmem:[%s2930_s4 + $0x18] sm:$0xff]  }
 0xda1   : > { %v1151_v46 = vsel %vm580_vm3, %v1150_v45, -inf }
 0xda2   : > { %1152 = vmax.xlane.f32.xlu0 %v1151_v46 }
 0xda4   : > { %v1255_v47 = vpop.f32.mrb[24].mxu0 }
 0xda5   : > { %v1261_v48 = vmul.f32 0.25, %v1255_v47  ;;  %v2055_v49 = vpop.f32.mrb[25].mxu0  ;;  %v1887_v47 = vld [vmem:[#allocation5 + $0xb] ss:$0 sm:$0xff] }
 0xda6   : > { %v1258_v50 = vpop.f32.mrb[26].mxu0 }
 0xda7   : > { %v2056_v51 = vpop.f32.mrb[27].mxu0  ;;  %v1262_v52 = vadd.f32 %v2699_v33, %v1261_v48 }
 0xda8   : > { %v2202_v51 = vld [vmem:[%s2931_s5 + $0x20] sm:$0xff]  }
 0xda9   : > { %v1263_v53 = vsel %vm580_vm3, %v1262_v52, -inf }
 0xdaa   : > { %1264 = vmax.xlane.f32.xlu1 %v1263_v53  ;;  %v2204_v53 = vld [vmem:[%s2931_s5 + $0x30] sm:$0xff]  }
 0xdbb   : > { %1163 = vrot.lane.b32.xlu1 %v1099_v34, %s2413_s27  ;;  %s413_s27 = scalar_lea.vmem [#allocation8], %s2640_s30 }
 0xdbc   : > { %s1732_s21 = sshll.u32 %s413_s27, 4  ;;  %s2884_s21 = int_to_ptr.vmem [resolvable:$true] %s1732_s21 }
 0xdbd   : > { %s2328_s25 = scalar_lea.vmem %s2884_s21, 16  ;;  %p2335_p9 = scmp.lt.s32.totalorder %s2884_s21, %s2333_s18 }
 0xdbe   : > { %p2329_p0 = scmp.ne.s32.totalorder %s2884_s21, %s2328_s25  ;;  %p2336_p12 = scmp.lt.s32.totalorder %s2334_s24, %s2328_s25 }
 0xdc0   : > { %p2330_p3 = pnand %p2329_p0, %p2958_p1  ;;  %p2337_p2 = por %p2336_p12, %p2335_p9 }
 0xdc2   : > { %p2331_p5 = pneg %p2330_p3 }
 0xdc4   : > { %p2338_p13 = pnand %p2337_p2, %p2331_p5 }
 0xe2f   : > { %v1153_v54 = vpop.xlane.xlu0 %1152 }
 0xe30   : > { %v1154_v55 = vsub.f32 %v1150_v45, %v1153_v54  ;;  %v1886_v45 = vld [vmem:[#allocation5 + $0xa] ss:$0 sm:$0xff] }
 0xe31   : > { %v2205_v54 = vld [vmem:[%s2931_s5 + $0x38] sm:$0xff]  }
 0xe32   : > { %v1155_v56 = vmul.f32 1.442695, %v1154_v55  ;;  %v1892_v55 = vld [vmem:[#allocation5 + $0xc] ss:$0 sm:$0xff] }
 0xe34   : > { %2226 = vpow2.f32 %v1155_v56 }
 0xe37   : > { %v1265_v57 = vpop.xlane.xlu1 %1264 }
 0xe38   : > { %v1266_v58 = vsub.f32 %v1262_v52, %v1265_v57  ;;  %v2203_v52 = vld [vmem:[%s2931_s5 + $0x28] sm:$0xff]  }
 0xe3a   : > { %v1267_v59 = vmul.f32 1.442695, %v1266_v58 }
 0xe3b   : > { %v1164_v60 = vpop.permute.xlu1 %1163 }
 0xe3c   : > { %2228 = vpow2.f32 %v1267_v59  ;;  %v1169_v61 = vsel %vm598_vm4, %v1164_v60, 0 }
 0xe3d   : > { %2046 = vmatpush3.bf16.msra.mxu1 %v1169_v61 }
 0xe3e   : > { %v2227_v62 = vpop.eup %2226  ;;  %2057 = vmatprep.subr.bf16.mxu1 %v2407_v8 }
 0xe3f   : > { %v1157_v33 = vsel %vm580_vm3, %v2227_v62, 0.0 }
 0xe40   : > { %1158 = vadd.xlane.f32.xlu0 %v1157_v33 }
 0xe46   : > { %v2229_v63 = vpop.eup %2228 }
 0xe47   : > { %v1269_v0 = vsel %vm580_vm3, %v2229_v63, 0.0 }
 0xe48   : > { %1270 = vadd.xlane.f32.xlu0 %v1269_v0 }
 0xe5e   : > { %1275 = vrot.lane.b32.xlu0 %v1099_v34, %s2956_s23 }
 0xecd   : > { %v1159_v1 = vpop.xlane.xlu0 %1158 }
 0xece   : > { %2230 = vrcp.f32 %v1159_v1 }
 0xed5   : > { %v1271_v2 = vpop.xlane.xlu0 %1270 }
 0xed6   : > { %2232 = vrcp.f32 %v1271_v2 }
 0xed8   : > { %v2231_v3 = vpop.eup %2230 }
 0xed9   : > { %v1161_v4 = vmul.f32 %v2231_v3, %v2227_v62  ;;  %v1276_v5 = vpop.permute.xlu0 %1275 }
 0xeda   : > { %v1281_v7 = vsel %vm598_vm4, %v1276_v5, 0 }
 0xedb   : > { %v1162_v6 = vpack.c.bf16 %v1161_v4, %v1161_v4 }
 0xedd   : > { %2048 = vmatmul.mubr.msk.bf16.vlgmr.msra.gmra.mrb[16].mxu1 %vm580_vm3, %v1162_v6  ;;  %v1904_v6 = vld [vmem:[#allocation5 + $0xd] ss:$0 sm:$0xff] }
 0xede   : > { %2058 = vmatpush3.bf16.msra.mxu1 %v1281_v7  ;;  %2059 = vmatprep.mubr.msk.bf16.mxu1 %vm2408_vm1, %v2407_v8 }
 0xedf   : > { %2071 = vmatprep.subr.bf16.mxu1 %v2407_v8 }
 0xee0   : > { %v2233_v9 = vpop.eup %2232 }
 0xee1   : > { %v1273_v10 = vmul.f32 %v2233_v9, %v2229_v63 }
 0xee3   : > { %v1274_v11 = vpack.c.bf16 %v1273_v10, %v1273_v10 }
 0xee5   : > { %2060 = vmatmul.mubr.msk.bf16.vlgmr.msra.gmra.mrb[20].mxu1 %vm580_vm3, %v1274_v11 }
 0xee6   : > { %2075 = vmatprep.mubr.msk.bf16.mxu1 %vm2408_vm1, %v2407_v8  ;;  %2072 = vmatpush3.bf16.msra.mxu1 %v2200_v40 }
 0xee7   : > { %2073 = vmatprep.subr.bf16.mxu1 %v2407_v8 }
 0xeea   : > { %2074 = vmatpush3.bf16.msra.mxu1 %v2201_v41 }
 0xeeb   : > { %2091 = vmatprep.subr.bf16.mxu1 %v2407_v8 }
 0xfb0   : > { %v1205_v14 = vpop.f32.mrb[16].mxu1 }
 0xfb1   : > { %v2049_v15 = vpop.f32.mrb[17].mxu1 }
 0xfb2   : > { %v1208_v16 = vpop.f32.mrb[18].mxu1 }
 0xfb3   : > { %v2050_v17 = vpop.f32.mrb[19].mxu1 }
 0xfb8   : > { %v1317_v19 = vpop.f32.mrb[20].mxu1 }
 0xfb9   : > { %1324 = vrot.lane.b32.xlu1 %v1317_v19, %s2957_s13  ;;  %v2061_v20 = vpop.f32.mrb[21].mxu1 }
 0xfba   : > { %v1320_v21 = vpop.f32.mrb[22].mxu1 }
 0xfbb   : > { %v2062_v22 = vpop.f32.mrb[23].mxu1  ;;  %v2206_v21 = vld [vmem:[#allocation7] sm:$0xff]  }
 0xfbc   : > { %v2207_v22 = vld [vmem:[#allocation7 + $0x8] sm:$0xff]  }
0x102b   : > { %v1325_v23 = vpop.permute.xlu1 %1324 }
0x102c   : > { %v1327_v24 = vsel %vm525_vm2, %v1205_v14, %v1325_v23 }
0x102d   : > { %v1328_v25 = vpack.c.bf16 %v1327_v24, %v1327_v24 }
0x102f   : > { %2068 = vmatmul.mubr.msk.bf16.vlgmr.msra.gmra.mrb[28].mxu0 %vm423_vm0, %v1328_v25 }
0x1030   : > { %2087 = vmatprep.mubr.msk.bf16.mxu0 %vm2408_vm1, %v2407_v8  ;;  %2080 = vmatpush3.bf16.msra.mxu0 %v2202_v51 }
0x1031   : > { %2081 = vmatprep.subr.bf16.mxu0 %v2407_v8 }
0x1034   : > { %2082 = vmatpush3.bf16.msra.mxu0 %v2203_v52 }
0x1035   : > { %2083 = vmatprep.subr.bf16.mxu0 %v2407_v8 }
0x1038   : > { %2084 = vmatpush3.bf16.msra.mxu0 %v2204_v53 }
0x1039   : > { %2085 = vmatprep.subr.bf16.mxu0 %v2407_v8 }
0x103c   : > { %2086 = vmatpush3.bf16.msra.mxu0 %v2205_v54 }
0x1102   : > { %v1387_v28 = vpop.f32.mrb[28].mxu0 }
0x1103   : > { %v1388_v29 = vadd.f32 %v1882_v27, %v1387_v28  ;;  %v2069_v30 = vpop.f32.mrb[29].mxu0  ;;  %v1910_v28 = vld [vmem:[#allocation5 + $0xe] ss:$0 sm:$0xff] }
0x1104   : > { %v1390_v31 = vpop.f32.mrb[30].mxu0  ;;  %v1911_v30 = vld [vmem:[#allocation5 + $0xf] ss:$0 sm:$0xff] }
0x1105   : > { %v2070_v32 = vpop.f32.mrb[31].mxu0  ;;  %v1393_v34 = vadd.f32 %v1388_v29, %v2775_v26 }
0x1107   : > { %v1394_v18 = vsel %vm423_vm0, %v1393_v34, 0.0 }
0x1108   : > { %1395 = vadd.xlane.f32.xlu1 %v1394_v18  ;;  %v2208_v18 = vld [vmem:[%s2935_s9] sm:$0xff]  }
0x1195   : > { %v1396_v35 = vpop.xlane.xlu1 %1395 }
0x1196   : > { %v1397_v36 = vmul.f32 0.03125, %v1396_v35  ;;  %v2209_v35 = vld [vmem:[%s2935_s9 + $0x8] sm:$0xff]  }
0x1198   : > { %v1398_v37 = vsub.f32 %v1393_v34, %v1397_v36  ;;  %v420_v36 = vld [vmem:[%s2933_s7 + $0x2] sm:$0x1] }
0x119a   : > { %v1399_v38 = vmul.f32 %v1398_v37, %v1398_v37 }
0x119c   : > { %v1400_v39 = vsel %vm423_vm0, %v1399_v38, 0.0 }
0x119d   : > { %1401 = vadd.xlane.f32.xlu0 %v1400_v39 }
0x122a   : > { %v1402_v26 = vpop.xlane.xlu0 %1401 }
0x122b   : > { %v1403_v42 = vmul.f32 0.03125, %v1402_v26 }
0x122d   : > { %v1404_v43 = vadd.f32 1e-12, %v1403_v42 }
0x122f   : > { %2234 = vrsqrt.f32 %v1404_v43 }
0x1239   : > { %v2235_v44 = vpop.eup %2234 }
0x123a   : > { %v1406_v46 = vmul.f32 %v2235_v44, %v1398_v37 }
0x123c   : > { %v1411_v48 = vmul.f32 %v1886_v45, %v1406_v46 }
0x123e   : > { %v1416_v49 = vadd.f32 %v1887_v47, %v1411_v48 }
0x1240   : > { %v1417_v50 = vpack.c.bf16 %v1416_v49, %v1416_v49 }
0x1242   : > { %2076 = vmatmul.mubr.msk.bf16.vlgmr.msra.gmra.mrb[24].mxu1 %vm423_vm0, %v1417_v50 }
0x1243   : > { %2095 = vmatprep.mubr.msk.bf16.mxu1 %vm2408_vm1, %v2407_v8  ;;  %2092 = vmatpush3.bf16.msra.mxu1 %v2206_v21 }
0x1244   : > { %2093 = vmatprep.subr.bf16.mxu1 %v2407_v8 }
0x1247   : > { %2094 = vmatpush3.bf16.msra.mxu1 %v2207_v22 }
0x1248   : > { %2099 = vmatprep.subr.bf16.mxu1 %v2407_v8 }
0x1315   : > { %v1476_v56 = vpop.f32.mrb[24].mxu1 }
0x1316   : > { %v1477_v57 = vadd.f32 %v1892_v55, %v1476_v56  ;;  %v2077_v58 = vpop.f32.mrb[25].mxu1 }
0x1317   : > { %v1479_v59 = vpop.f32.mrb[26].mxu1 }
0x1318   : > { %v1483_v60 = vmul.f32 0.044715, %v1477_v57  ;;  %v2078_v61 = vpop.f32.mrb[27].mxu1  ;;  %v1482_v2 = vmul.f32 0.5, %v1477_v57 }
0x131a   : > { %v1484_v62 = vmul.f32 %v1483_v60, %v1477_v57 }
0x131c   : > { %v1485_v33 = vmul.f32 %v1484_v62, %v1477_v57 }
0x131e   : > { %v1486_v63 = vadd.f32 %v1485_v33, %v1477_v57 }
0x1320   : > { %v1487_v0 = vmul.f32 0.7978846, %v1486_v63 }
0x1322   : > { %2236 = vtanh.f32 %v1487_v0 }
0x132c   : > { %v2237_v1 = vpop.eup %2236 }
0x132d   : > { %v1489_v3 = vadd.f32 1.0, %v2237_v1 }
0x132f   : > { %v1490_v4 = vmul.f32 %v1489_v3, %v1482_v2 }
0x1331   : > { %v1491_v5 = vpack.c.bf16 %v1490_v4, %v1490_v4 }
0x1333   : > { %2088 = vmatmul.mubr.msk.bf16.vlgmr.msra.gmra.mrb[32].mxu0 %vm957_vm5, %v1491_v5 }
0x1406   : > { %v1566_v7 = vpop.f32.mrb[32].mxu0 }
0x1407   : > { %v1567_v9 = vadd.f32 %v1904_v6, %v1566_v7  ;;  %v2089_v10 = vpop.f32.mrb[33].mxu0 }
0x1408   : > { %v1569_v11 = vpop.f32.mrb[34].mxu0 }
0x1409   : > { %v2090_v12 = vpop.f32.mrb[35].mxu0  ;;  %v1572_v13 = vadd.f32 %v1567_v9, %v1416_v49 }
0x140b   : > { %v1573_v14 = vsel %vm423_vm0, %v1572_v13, 0.0 }
0x140c   : > { %1574 = vadd.xlane.f32.xlu0 %v1573_v14 }
0x1499   : > { %v1575_v15 = vpop.xlane.xlu0 %1574 }
0x149a   : > { %v1576_v16 = vmul.f32 0.03125, %v1575_v15 }
0x149c   : > { %v1577_v17 = vsub.f32 %v1572_v13, %v1576_v16 }
0x149e   : > { %v1578_v19 = vmul.f32 %v1577_v17, %v1577_v17 }
0x14a0   : > { %v1579_v20 = vsel %vm423_vm0, %v1578_v19, 0.0 }
0x14a1   : > { %1580 = vadd.xlane.f32.xlu1 %v1579_v20 }
0x152e   : > { %v1581_v23 = vpop.xlane.xlu1 %1580 }
0x152f   : > { %v1582_v24 = vmul.f32 0.03125, %v1581_v23 }
0x1531   : > { %v1583_v25 = vadd.f32 1e-12, %v1582_v24 }
0x1533   : > { %2238 = vrsqrt.f32 %v1583_v25 }
0x153d   : > { %v2239_v27 = vpop.eup %2238 }
0x153e   : > { %v1585_v29 = vmul.f32 %v2239_v27, %v1577_v17 }
0x1540   : > { %v1590_v31 = vmul.f32 %v1910_v28, %v1585_v29 }
0x1542   : > { %v1595_v32 = vadd.f32 %v1911_v30, %v1590_v31 }
0x1544   : > { %v1596_v34 = vpack.c.bf16 %v1595_v32, %v1595_v32 }
0x1546   : > { %2096 = vmatmul.mubr.msk.bf16.vlgmr.msra.gmra.mrb[28].mxu1 %vm423_vm0, %v1596_v34 }
0x1547   : > { %2103 = vmatprep.mubr.msk.bf16.mxu1 %vm2408_vm1, %v2407_v8  ;;  %2100 = vmatpush3.bf16.msra.mxu1 %v2208_v18 }
0x1548   : > { %2101 = vmatprep.subr.bf16.mxu1 %v2407_v8  ;;  %v421_v8 = vld [vmem:[%s2933_s7 + $0x3] sm:$0x1] }
0x154b   : > { %2102 = vmatpush3.bf16.msra.mxu1 %v2209_v35 }
0x1619   : > { %v1650_v37 = vpop.f32.mrb[28].mxu1 }
0x161a   : > { %v1651_v38 = vadd.f32 %v1650_v37, %v420_v36  ;;  %v2097_v39 = vpop.f32.mrb[29].mxu1 }
0x161b   : > { %v1653_v40 = vpop.f32.mrb[30].mxu1 }
0x161c   : > { %2240 = vtanh.f32 %v1651_v38  ;;  %v2098_v41 = vpop.f32.mrb[31].mxu1 }
0x1626   : > { %v2241_v26 = vpop.eup %2240 }
0x1627   : > { %v1657_v42 = vpack.c.bf16 %v2241_v26, %v2241_v26 }
0x1629   : > { %2104 = vmatmul.mubr.msk.bf16.vlgmr.msra.gmra.mrb[32].mxu1 %vm423_vm0, %v1657_v42 }
0x16fc   : > { %v1711_v43 = vpop.f32.mrb[32].mxu1 }
0x16fd   : > { %v1712_v44 = vadd.f32 %v1711_v43, %v421_v8  ;;  %v2105_v45 = vpop.f32.mrb[33].mxu1 }
0x16fe   : > { %v1714_v46 = vpop.f32.mrb[34].mxu1 }
0x16ff   : > { %v2106_v47 = vpop.f32.mrb[35].mxu1  ;;  %1718 = vst.msk [vmem:[%s413_s27] sm:$0x1] %vm1717_vm6, %v1712_v44 }
0x1700   : > { %2341 = shalt.err (!%p2338_p13)
}
0x1701   : > { %s2342_s30 = scalar_lea.hbm %s2882_s26, 16  ;;  %s2346_s20 = scalar_lea.hbm %s2936_s10, 32 }
0x1702   : > { %p2343_p6 = scmp.ne.s32.totalorder %s2882_s26, %s2342_s30  ;;  %p2347_p7 = scmp.lt.u32.totalorder %s2882_s26, %s2936_s10 }
0x1703   : > { %p2348_p11 = scmp.lt.u32.totalorder %s2346_s20, %s2342_s30  ;;  %p2350_p0 = scmp.lt.u32.totalorder %s2342_s30, %s2882_s26 }
0x1704   : > { %p2344_p10 = pnand %p2343_p6, %p2958_p1 }
0x1705   : > { %p2349_p8 = por %p2348_p11, %p2347_p7 }
0x1706   : > { %p2345_p4 = pneg %p2344_p10 }
0x1707   : > { %p2351_p3 = por %p2350_p0, %p2349_p8 }
0x1709   : > { %p2352_p5 = pnand %p2351_p3, %p2345_p4 }
0x170b   : > { %2355 = shalt.err (!%p2352_p5)
}
0x170c   : > { %2117 = dma.vmem_to_hbm [thread:$0]  (%p2958_p1), %s2884_s21, 16, %s2882_s26, %s1720_s17  }
0x170d PF: > { %s2959_s29 = sld [smem:[#allocation12_spill]]  ;;  %s2960_s25 = sld [smem:[#allocation13_spill]] }
0x170e   : > { %p2962_p12 = scmp.ge.s32.totalorder %s2398_s16, 2 }
0x1713   : > { %s1744_s19 = sand.u32 1, %s2959_s29   ;;  %p2961_p9 = scmp.ne.s32.totalorder %s2960_s25, 0 }
0x1714   : > { %s1745_s18 = scalar_lea.sflag [#allocation4], %s1744_s19 }
0x1715   : > { %p2131_p2 = pnand %p2962_p12, %p2961_p9 }
0x1717   : > { %2381 = dma.done.wait (!%p2131_p2), %s1745_s18, 16  }
0x1718   : > { %2383 = vsyncadd (!%p2131_p2), %s1745_s18, 4294967280  ;;  %p24_p13 = scmp.ge.s32.totalorder %s2581_s28, 4   ;;  %s2963_s13 = smov %s2390_s14 }
0x1719   : > { %s2964_s14 = smov %s2394_s15  ;;  %s2965_s15 = smov %s2590_s11 }
0x171a   : > { %s2966_s16 = smov %s2581_s28  ;;  %26 = sbr.rel (!%p24_p13) target bundleno = 6 (0x6), region = 121 }
0x1721   :  { %1749 = vsyncpa [#allocation3], 1 }
0x1722   :  { %1751 = vsyncpa [#allocation3 + $0x1], 1 }
0x1723   :  { %1752 = vsyncpa [#allocation6], 1 }
0x1724   :  { %1753 = vsyncpa [#allocation4], 1 }
0x1725   :  { %1755 = vsyncpa [#allocation4 + $0x1], 1 }

</bundles_post_ra>
